<compile_context>
chip_gen: v7x
topology: tpu7x:2x2x1
jax: 0.10.0
libtpu: 0.0.40
codegen_flags: <defaults>
</compile_context>

<pallas_src>
import functools

import jax
import jax.numpy as jnp
from jax.experimental import pallas as pl
from jax.experimental.pallas import tpu as pltpu


def _round_up(x, m):
    return (x + m - 1) // m * m


def _divisors(n):
    return [d for d in range(1, n + 1) if n % d == 0]


def _vmem_capacity_bytes():
    """Per-core VMEM capacity; conservative 64 MiB fallback (v7x-class)."""
    try:
        info = pltpu.get_tpu_info()
        cap = getattr(info, "vmem_capacity_bytes", None)
        if cap:
            return int(cap)
    except Exception:
        pass
    return 64 * 1024 * 1024


def _choose_tile_h(h_out, w_out, fits, target_m):
    """Divisor-of-H_out tiling (tail-safe) with M = tile_h*W_out near target_m."""
    fitting = [d for d in _divisors(h_out) if fits(d)]
    if not fitting:
        return 1
    return min(fitting, key=lambda d: (abs(d * w_out - target_m), -d))


# ---------------------------------------------------------------------------
# Pass 1: dilated conv tile (per-tap accumulated MXU matmuls) + partial BN stats
# ---------------------------------------------------------------------------
def _conv_stats_kernel(xp_ref, w_ref, conv_ref, stats_ref, *,
                       kh_size, kw_size, dilation, tile_h, compute_dtype):
    """xp_ref:    (1, Hp, Wp, Cin)       padded image of batch item n (block index
                                         constant across h-tiles -> DMA reused)
       w_ref:     (KH*KW*Cin, Cout_p)    tap-major flattened weights (compute dtype)
       conv_ref:  (1, TH, W_out, Cout_p) conv output tile
       stats_ref: (1, 2, Cout_p)         per-tile [sum, sum_sq] over TH*W_out pixels
    """
    _, th, w_out, cout_p = conv_ref.shape
    cin = xp_ref.shape[-1]

    h0 = pl.multiple_of(pl.program_id(1) * tile_h, tile_h)

    # KH*KW accumulated matmuls instead of an im2col scratch: no tile-sized
    # vst/vld round trips, and per-tap K = Cin already feeds the MXU well at
    # realistic ASPP channel counts.
    acc = jnp.zeros((th * w_out, cout_p), jnp.float32)
    for kh in range(kh_size):
        for kw in range(kw_size):
            tap = kh * kw_size + kw
            patch = xp_ref[0,
                           pl.ds(h0 + kh * dilation, th),
                           kw * dilation: kw * dilation + w_out,
                           :]                                    # (TH, W_out, Cin)
            lhs = patch.reshape(th * w_out, cin).astype(compute_dtype)
            rhs = w_ref[tap * cin:(tap + 1) * cin, :]
            acc = acc + jnp.dot(lhs, rhs, preferred_element_type=jnp.float32)

    # Partial BN statistics in f32 (pre-downcast), finalized in the wrapper.
    stats_ref[0, 0:1, :] = jnp.sum(acc, axis=0, keepdims=True)
    stats_ref[0, 1:2, :] = jnp.sum(acc * acc, axis=0, keepdims=True)

    conv_ref[...] = acc.reshape(1, th, w_out, cout_p).astype(conv_ref.dtype)


# ---------------------------------------------------------------------------
# Pass 2: BN apply (global stats folded into scale/shift) + ReLU
# ---------------------------------------------------------------------------
def _bn_relu_kernel(conv_ref, scale_ref, shift_ref, out_ref):
    """conv_ref: (1, TH2, W_out, Cout_p); scale_ref/shift_ref: (1, Cout_p) f32."""
    y = conv_ref[...].astype(jnp.float32) * scale_ref[...] + shift_ref[...]
    out_ref[...] = jnp.maximum(y, 0.0).astype(out_ref.dtype)


# ---------------------------------------------------------------------------
# Wrapper
# ---------------------------------------------------------------------------
def aspp_forward(x_nchw, w_hwio, gamma, beta, *, padding, dilation,
                 compute_dtype=jnp.bfloat16, tile_h=None, eps=1e-5):
    N, Cin, H, W = x_nchw.shape
    KH, KW, _, Cout = w_hwio.shape
    out_dtype = x_nchw.dtype
    compute_dtype = jnp.dtype(compute_dtype)

    H_out = H + 2 * padding - dilation * (KH - 1)
    W_out = W + 2 * padding - dilation * (KW - 1)
    Hp, Wp = H + 2 * padding, W + 2 * padding

    # Lane-dense channel axis: pad Cout to a multiple of 128.
    Cout_p = _round_up(Cout, 128)
    K = KH * KW * Cin

    c_bytes = compute_dtype.itemsize
    o_bytes = jnp.dtype(out_dtype).itemsize

    vmem_cap = _vmem_capacity_bytes()
    vmem_limit = max(32 * 1024 * 1024, min(int(vmem_cap * 0.85), 100 * 1024 * 1024))
    tile_budget = int(vmem_limit * 0.9)

    def pass1_bytes(d):
        m = d * W_out
        return (2 * Hp * Wp * Cin * c_bytes        # padded image (double-buffered)
                + 2 * K * Cout_p * c_bytes         # weights (double-buffered)
                + 2 * m * Cout_p * c_bytes         # conv output tile
                + 2 * 2 * Cout_p * 4               # stats tile
                + m * Cout_p * 4                   # f32 accumulator
                + 2 * m * Cin * c_bytes)           # per-tap operand staging

    if tile_h is None or H_out % tile_h != 0:
        tile_h = _choose_tile_h(H_out, W_out,
                                lambda d: pass1_bytes(d) <= tile_budget,
                                target_m=1024)
    num_h = H_out // tile_h

    # Glue: NCHW -> NHWC (channels on lanes), cast to the MXU operand dtype,
    # zero padding for the dilated taps.
    # TODO(synk): fold the zero padding / boundary masking into pass 1 (and use
    # a manual halo-slab DMA instead of the whole-image block) to avoid the
    # padded-copy HBM round trip and to fit very large Cin images in v7x VMEM.
    x_nhwc = jnp.transpose(x_nchw, (0, 2, 3, 1)).astype(compute_dtype)
    xp = jnp.pad(x_nhwc, ((0, 0), (padding, padding), (padding, padding), (0, 0)))

    w_p = jnp.pad(w_hwio, ((0, 0), (0, 0), (0, 0), (0, Cout_p - Cout)))
    w_flat = w_p.reshape(K, Cout_p).astype(compute_dtype)   # tap-major K ordering

    cparams = pltpu.CompilerParams(
        dimension_semantics=("parallel", "parallel"),   # shards across TCs on v7x
        vmem_limit_bytes=vmem_limit,
    )

    conv_kernel = functools.partial(
        _conv_stats_kernel,
        kh_size=KH, kw_size=KW, dilation=dilation, tile_h=tile_h,
        compute_dtype=compute_dtype)

    # TODO(synk): the weight block is grid-invariant and could be single-buffered
    # (pipeline_mode=pl.Buffered(1)) to halve its VMEM footprint on v7x.
    conv, stats = pl.pallas_call(
        conv_kernel,
        out_shape=(
            jax.ShapeDtypeStruct((N, H_out, W_out, Cout_p), compute_dtype),
            jax.ShapeDtypeStruct((N * num_h, 2, Cout_p), jnp.float32),
        ),
        grid_spec=pltpu.PrefetchScalarGridSpec(
            num_scalar_prefetch=0,
            grid=(N, num_h),
            in_specs=[
                # Full padded image per batch item; block index constant over the
                # h axis so the input DMA is not re-issued per h-tile.
                pl.BlockSpec((1, Hp, Wp, Cin), lambda n, h: (n, 0, 0, 0)),
                pl.BlockSpec((K, Cout_p), lambda n, h: (0, 0)),
            ],
            out_specs=(
                pl.BlockSpec((1, tile_h, W_out, Cout_p), lambda n, h: (n, h, 0, 0)),
                pl.BlockSpec((1, 2, Cout_p), lambda n, h: (n * num_h + h, 0, 0)),
            ),
        ),
        compiler_params=cparams,
    )(xp, w_flat)

    # Finalize global batch statistics (tiny reduction) and fold BN into a
    # single per-channel scale/shift (f32 throughout).
    cnt = jnp.float32(N * H_out * W_out)
    total = jnp.sum(stats[:, 0, :], axis=0)
    total_sq = jnp.sum(stats[:, 1, :], axis=0)
    mean = total / cnt
    # NOTE: E[x^2]-E[x]^2 in f32 can lose precision for huge, high-mean feature
    # maps; a Welford-style merge of the per-tile partials would be more robust.
    var = jnp.maximum(total_sq / cnt - mean * mean, 0.0)
    inv = jax.lax.rsqrt(var + eps)
    gamma_p = jnp.pad(gamma.astype(jnp.float32), (0, Cout_p - Cout))
    beta_p = jnp.pad(beta.astype(jnp.float32), (0, Cout_p - Cout))
    scale = (gamma_p * inv).reshape(1, Cout_p)
    shift = (beta_p - mean * gamma_p * inv).reshape(1, Cout_p)

    # Pass 2: big elementwise blocks (as many rows as fit the VMEM budget).
    def pass2_bytes(d):
        blk = d * W_out * Cout_p
        return 2 * blk * (c_bytes + o_bytes) + 2 * 4 * Cout_p * 4

    tile_h2 = _choose_tile_h(H_out, W_out,
                             lambda d: pass2_bytes(d) <= tile_budget,
                             target_m=1 << 30)   # take the largest that fits
    num_h2 = H_out // tile_h2

    out_nhwc = pl.pallas_call(
        _bn_relu_kernel,
        out_shape=jax.ShapeDtypeStruct((N, H_out, W_out, Cout_p), out_dtype),
        grid_spec=pltpu.PrefetchScalarGridSpec(
            num_scalar_prefetch=0,
            grid=(N, num_h2),
            in_specs=[
                pl.BlockSpec((1, tile_h2, W_out, Cout_p), lambda n, h: (n, h, 0, 0)),
                pl.BlockSpec((1, Cout_p), lambda n, h: (0, 0)),
                pl.BlockSpec((1, Cout_p), lambda n, h: (0, 0)),
            ],
            out_specs=pl.BlockSpec((1, tile_h2, W_out, Cout_p),
                                   lambda n, h: (n, h, 0, 0)),
        ),
        compiler_params=cparams,
    )(conv, scale, shift)

    # TODO(synk): BatchNorm running_mean/running_var buffer updates (training-mode
    # side effect of the PyTorch module) are not produced; forward output only.
    # Slice off padded channels and return NCHW (XLA fuses slice + transpose).
    return jnp.transpose(out_nhwc[..., :Cout], (0, 3, 1, 2))


# ---------------------------------------------------------------------------
# Pure-JAX reference mirroring PyTorch semantics (correctness check only)
# ---------------------------------------------------------------------------
def _reference(x_nchw, w_hwio, gamma, beta, *, padding, dilation):
    w_oihw = jnp.transpose(w_hwio, (3, 2, 0, 1))
    conv = jax.lax.conv_general_dilated(
        x_nchw, w_oihw, window_strides=(1, 1),
        padding=[(padding, padding), (padding, padding)],
        rhs_dilation=(dilation, dilation),
        dimension_numbers=("NCHW", "OIHW", "NCHW"),
    )
    mean = jnp.mean(conv, axis=(0, 2, 3), keepdims=True)
    var = jnp.mean((conv - mean) ** 2, axis=(0, 2, 3), keepdims=True)
    y = (conv - mean) * jax.lax.rsqrt(var + 1e-5)
    y = y * gamma.reshape(1, -1, 1, 1) + beta.reshape(1, -1, 1, 1)
    return jnp.maximum(y, 0.0)


if __name__ == "__main__":
    # Module hyper-params (dilated 3x3 ASPP branch, small sizes)
    inplanes, planes = 4, 8
    kernel_size, dilation = 3, 2
    padding = dilation  # "same" output for the dilated 3x3 branch

    N, H, W = 2, 16, 16

    key = jax.random.PRNGKey(0)
    kx, kw = jax.random.split(key)

    x = jax.random.normal(kx, (N, inplanes, H, W), dtype=jnp.float32)

    # kaiming_normal_ (fan_in, gain=sqrt(2)) on the conv weight, deterministic
    fan_in = inplanes * kernel_size * kernel_size
    std = (2.0 / fan_in) ** 0.5
    w_hwio = std * jax.random.normal(
        kw, (kernel_size, kernel_size, inplanes, planes), dtype=jnp.float32)

    # BatchNorm init per _init_weight: weight=1, bias=0
    gamma = jnp.ones((planes,), jnp.float32)
    beta = jnp.zeros((planes,), jnp.float32)

    ref = _reference(x, w_hwio, gamma, beta, padding=padding, dilation=dilation)

    # Default path: bf16 MXU operands + bf16 conv intermediate (perf feedback).
    out = jax.block_until_ready(
        aspp_forward(x, w_hwio, gamma, beta, padding=padding, dilation=dilation))
    assert out.shape == (N, planes, H, W)
    assert jnp.allclose(out, ref, atol=3e-2, rtol=3e-2)

    # Full-f32 path for a tight numerical check against the reference.
    out_f32 = jax.block_until_ready(
        aspp_forward(x, w_hwio, gamma, beta, padding=padding, dilation=dilation,
                     compute_dtype=jnp.float32))
    assert jnp.allclose(out_f32, ref, atol=1e-4, rtol=1e-4)

    print("KERNEL_OK")
</pallas_src>

<mosaic_0001>
module attributes {stable_mosaic.version = 11 : i64} {
  func.func @_conv_stats_kernel(%arg0: i32, %arg1: i32, %arg2: memref<1x20x20x4xbf16, #tpu.memory_space<vmem>>, %arg3: memref<36x128xbf16, #tpu.memory_space<vmem>>, %arg4: memref<1x16x16x128xbf16, #tpu.memory_space<vmem>>, %arg5: memref<1x2x128xf32, #tpu.memory_space<vmem>>) attributes {dimension_semantics = [#tpu.dimension_semantics<parallel>, #tpu.dimension_semantics<parallel>], iteration_bounds = array<i64: 2, 1>, scalar_prefetch = 0 : i64, scratch_operands = 0 : i64, tpu.core_type = #tpu.core_type<tc>, window_params = [{transform_indices = @transform_0, window_bounds = array<i64: 1, 20, 20, 4>}, {pipeline_mode = #tpu.pipeline_mode<synchronous>, transform_indices = @transform_1, window_bounds = array<i64: 36, 128>}, {transform_indices = @transform_2, window_bounds = array<i64: 1, 16, 16, 128>}, {transform_indices = @transform_3, window_bounds = array<i64: 1, 2, 128>}]} {
    %c16_i32 = arith.constant 16 : i32
    %0 = arith.muli %arg1, %c16_i32 : i32
    %1 = tpu.assume_multiple %0, 16 : i32
    %cst = arith.constant 0.000000e+00 : f32
    %2 = vector.broadcast %cst : f32 to vector<256x128xf32>
    %c0_i32 = arith.constant 0 : i32
    %3 = arith.addi %1, %c0_i32 : i32
    %c0 = arith.constant 0 : index
    %4 = arith.index_cast %3 : i32 to index
    %c0_0 = arith.constant 0 : index
    %c0_1 = arith.constant 0 : index
    %5 = vector.load %arg2[%c0, %4, %c0_0, %c0_1] : memref<1x20x20x4xbf16, #tpu.memory_space<vmem>>, vector<1x16x16x4xbf16>
    %6 = vector.shape_cast %5 : vector<1x16x16x4xbf16> to vector<16x16x4xbf16>
    %7 = vector.shape_cast %6 : vector<16x16x4xbf16> to vector<256x4xbf16>
    %c0_2 = arith.constant 0 : index
    %c0_3 = arith.constant 0 : index
    %8 = vector.load %arg3[%c0_2, %c0_3] : memref<36x128xbf16, #tpu.memory_space<vmem>>, vector<4x128xbf16>
    %cst_4 = arith.constant dense<0.000000e+00> : vector<256x128xf32>
    %9 = tpu.matmul %7, %8, %cst_4 {dimension_numbers = #tpu.dot_dimension_numbers<[1], [0], [0], [1], [0, 0, 1, 1], [], []>} : vector<256x4xbf16>, vector<4x128xbf16>, vector<256x128xf32> -> vector<256x128xf32>
    %10 = arith.addf %2, %9 : vector<256x128xf32>
    %c0_i32_5 = arith.constant 0 : i32
    %11 = arith.addi %1, %c0_i32_5 : i32
    %c0_6 = arith.constant 0 : index
    %12 = arith.index_cast %11 : i32 to index
    %c2 = arith.constant 2 : index
    %c0_7 = arith.constant 0 : index
    %13 = vector.load %arg2[%c0_6, %12, %c2, %c0_7] : memref<1x20x20x4xbf16, #tpu.memory_space<vmem>>, vector<1x16x16x4xbf16>
    %14 = vector.shape_cast %13 : vector<1x16x16x4xbf16> to vector<16x16x4xbf16>
    %15 = vector.shape_cast %14 : vector<16x16x4xbf16> to vector<256x4xbf16>
    %c4 = arith.constant 4 : index
    %c0_8 = arith.constant 0 : index
    %16 = vector.load %arg3[%c4, %c0_8] : memref<36x128xbf16, #tpu.memory_space<vmem>>, vector<4x128xbf16>
    %cst_9 = arith.constant dense<0.000000e+00> : vector<256x128xf32>
    %17 = tpu.matmul %15, %16, %cst_9 {dimension_numbers = #tpu.dot_dimension_numbers<[1], [0], [0], [1], [0, 0, 1, 1], [], []>} : vector<256x4xbf16>, vector<4x128xbf16>, vector<256x128xf32> -> vector<256x128xf32>
    %18 = arith.addf %10, %17 : vector<256x128xf32>
    %c0_i32_10 = arith.constant 0 : i32
    %19 = arith.addi %1, %c0_i32_10 : i32
    %c0_11 = arith.constant 0 : index
    %20 = arith.index_cast %19 : i32 to index
    %c4_12 = arith.constant 4 : index
    %c0_13 = arith.constant 0 : index
    %21 = vector.load %arg2[%c0_11, %20, %c4_12, %c0_13] : memref<1x20x20x4xbf16, #tpu.memory_space<vmem>>, vector<1x16x16x4xbf16>
    %22 = vector.shape_cast %21 : vector<1x16x16x4xbf16> to vector<16x16x4xbf16>
    %23 = vector.shape_cast %22 : vector<16x16x4xbf16> to vector<256x4xbf16>
    %c8 = arith.constant 8 : index
    %c0_14 = arith.constant 0 : index
    %24 = vector.load %arg3[%c8, %c0_14] : memref<36x128xbf16, #tpu.memory_space<vmem>>, vector<4x128xbf16>
    %cst_15 = arith.constant dense<0.000000e+00> : vector<256x128xf32>
    %25 = tpu.matmul %23, %24, %cst_15 {dimension_numbers = #tpu.dot_dimension_numbers<[1], [0], [0], [1], [0, 0, 1, 1], [], []>} : vector<256x4xbf16>, vector<4x128xbf16>, vector<256x128xf32> -> vector<256x128xf32>
    %26 = arith.addf %18, %25 : vector<256x128xf32>
    %c2_i32 = arith.constant 2 : i32
    %27 = arith.addi %1, %c2_i32 : i32
    %c0_16 = arith.constant 0 : index
    %28 = arith.index_cast %27 : i32 to index
    %c0_17 = arith.constant 0 : index
    %c0_18 = arith.constant 0 : index
    %29 = vector.load %arg2[%c0_16, %28, %c0_17, %c0_18] : memref<1x20x20x4xbf16, #tpu.memory_space<vmem>>, vector<1x16x16x4xbf16>
    %30 = vector.shape_cast %29 : vector<1x16x16x4xbf16> to vector<16x16x4xbf16>
    %31 = vector.shape_cast %30 : vector<16x16x4xbf16> to vector<256x4xbf16>
    %c12 = arith.constant 12 : index
    %c0_19 = arith.constant 0 : index
    %32 = vector.load %arg3[%c12, %c0_19] : memref<36x128xbf16, #tpu.memory_space<vmem>>, vector<4x128xbf16>
    %cst_20 = arith.constant dense<0.000000e+00> : vector<256x128xf32>
    %33 = tpu.matmul %31, %32, %cst_20 {dimension_numbers = #tpu.dot_dimension_numbers<[1], [0], [0], [1], [0, 0, 1, 1], [], []>} : vector<256x4xbf16>, vector<4x128xbf16>, vector<256x128xf32> -> vector<256x128xf32>
    %34 = arith.addf %26, %33 : vector<256x128xf32>
    %c2_i32_21 = arith.constant 2 : i32
    %35 = arith.addi %1, %c2_i32_21 : i32
    %c0_22 = arith.constant 0 : index
    %36 = arith.index_cast %35 : i32 to index
    %c2_23 = arith.constant 2 : index
    %c0_24 = arith.constant 0 : index
    %37 = vector.load %arg2[%c0_22, %36, %c2_23, %c0_24] : memref<1x20x20x4xbf16, #tpu.memory_space<vmem>>, vector<1x16x16x4xbf16>
    %38 = vector.shape_cast %37 : vector<1x16x16x4xbf16> to vector<16x16x4xbf16>
    %39 = vector.shape_cast %38 : vector<16x16x4xbf16> to vector<256x4xbf16>
    %c16 = arith.constant 16 : index
    %c0_25 = arith.constant 0 : index
    %40 = vector.load %arg3[%c16, %c0_25] : memref<36x128xbf16, #tpu.memory_space<vmem>>, vector<4x128xbf16>
    %cst_26 = arith.constant dense<0.000000e+00> : vector<256x128xf32>
    %41 = tpu.matmul %39, %40, %cst_26 {dimension_numbers = #tpu.dot_dimension_numbers<[1], [0], [0], [1], [0, 0, 1, 1], [], []>} : vector<256x4xbf16>, vector<4x128xbf16>, vector<256x128xf32> -> vector<256x128xf32>
    %42 = arith.addf %34, %41 : vector<256x128xf32>
    %c2_i32_27 = arith.constant 2 : i32
    %43 = arith.addi %1, %c2_i32_27 : i32
    %c0_28 = arith.constant 0 : index
    %44 = arith.index_cast %43 : i32 to index
    %c4_29 = arith.constant 4 : index
    %c0_30 = arith.constant 0 : index
    %45 = vector.load %arg2[%c0_28, %44, %c4_29, %c0_30] : memref<1x20x20x4xbf16, #tpu.memory_space<vmem>>, vector<1x16x16x4xbf16>
    %46 = vector.shape_cast %45 : vector<1x16x16x4xbf16> to vector<16x16x4xbf16>
    %47 = vector.shape_cast %46 : vector<16x16x4xbf16> to vector<256x4xbf16>
    %c20 = arith.constant 20 : index
    %c0_31 = arith.constant 0 : index
    %48 = vector.load %arg3[%c20, %c0_31] : memref<36x128xbf16, #tpu.memory_space<vmem>>, vector<4x128xbf16>
    %cst_32 = arith.constant dense<0.000000e+00> : vector<256x128xf32>
    %49 = tpu.matmul %47, %48, %cst_32 {dimension_numbers = #tpu.dot_dimension_numbers<[1], [0], [0], [1], [0, 0, 1, 1], [], []>} : vector<256x4xbf16>, vector<4x128xbf16>, vector<256x128xf32> -> vector<256x128xf32>
    %50 = arith.addf %42, %49 : vector<256x128xf32>
    %c4_i32 = arith.constant 4 : i32
    %51 = arith.addi %1, %c4_i32 : i32
    %c0_33 = arith.constant 0 : index
    %52 = arith.index_cast %51 : i32 to index
    %c0_34 = arith.constant 0 : index
    %c0_35 = arith.constant 0 : index
    %53 = vector.load %arg2[%c0_33, %52, %c0_34, %c0_35] : memref<1x20x20x4xbf16, #tpu.memory_space<vmem>>, vector<1x16x16x4xbf16>
    %54 = vector.shape_cast %53 : vector<1x16x16x4xbf16> to vector<16x16x4xbf16>
    %55 = vector.shape_cast %54 : vector<16x16x4xbf16> to vector<256x4xbf16>
    %c24 = arith.constant 24 : index
    %c0_36 = arith.constant 0 : index
    %56 = vector.load %arg3[%c24, %c0_36] : memref<36x128xbf16, #tpu.memory_space<vmem>>, vector<4x128xbf16>
    %cst_37 = arith.constant dense<0.000000e+00> : vector<256x128xf32>
    %57 = tpu.matmul %55, %56, %cst_37 {dimension_numbers = #tpu.dot_dimension_numbers<[1], [0], [0], [1], [0, 0, 1, 1], [], []>} : vector<256x4xbf16>, vector<4x128xbf16>, vector<256x128xf32> -> vector<256x128xf32>
    %58 = arith.addf %50, %57 : vector<256x128xf32>
    %c4_i32_38 = arith.constant 4 : i32
    %59 = arith.addi %1, %c4_i32_38 : i32
    %c0_39 = arith.constant 0 : index
    %60 = arith.index_cast %59 : i32 to index
    %c2_40 = arith.constant 2 : index
    %c0_41 = arith.constant 0 : index
    %61 = vector.load %arg2[%c0_39, %60, %c2_40, %c0_41] : memref<1x20x20x4xbf16, #tpu.memory_space<vmem>>, vector<1x16x16x4xbf16>
    %62 = vector.shape_cast %61 : vector<1x16x16x4xbf16> to vector<16x16x4xbf16>
    %63 = vector.shape_cast %62 : vector<16x16x4xbf16> to vector<256x4xbf16>
    %c28 = arith.constant 28 : index
    %c0_42 = arith.constant 0 : index
    %64 = vector.load %arg3[%c28, %c0_42] : memref<36x128xbf16, #tpu.memory_space<vmem>>, vector<4x128xbf16>
    %cst_43 = arith.constant dense<0.000000e+00> : vector<256x128xf32>
    %65 = tpu.matmul %63, %64, %cst_43 {dimension_numbers = #tpu.dot_dimension_numbers<[1], [0], [0], [1], [0, 0, 1, 1], [], []>} : vector<256x4xbf16>, vector<4x128xbf16>, vector<256x128xf32> -> vector<256x128xf32>
    %66 = arith.addf %58, %65 : vector<256x128xf32>
    %c4_i32_44 = arith.constant 4 : i32
    %67 = arith.addi %1, %c4_i32_44 : i32
    %c0_45 = arith.constant 0 : index
    %68 = arith.index_cast %67 : i32 to index
    %c4_46 = arith.constant 4 : index
    %c0_47 = arith.constant 0 : index
    %69 = vector.load %arg2[%c0_45, %68, %c4_46, %c0_47] : memref<1x20x20x4xbf16, #tpu.memory_space<vmem>>, vector<1x16x16x4xbf16>
    %70 = vector.shape_cast %69 : vector<1x16x16x4xbf16> to vector<16x16x4xbf16>
    %71 = vector.shape_cast %70 : vector<16x16x4xbf16> to vector<256x4xbf16>
    %c32 = arith.constant 32 : index
    %c0_48 = arith.constant 0 : index
    %72 = vector.load %arg3[%c32, %c0_48] : memref<36x128xbf16, #tpu.memory_space<vmem>>, vector<4x128xbf16>
    %cst_49 = arith.constant dense<0.000000e+00> : vector<256x128xf32>
    %73 = tpu.matmul %71, %72, %cst_49 {dimension_numbers = #tpu.dot_dimension_numbers<[1], [0], [0], [1], [0, 0, 1, 1], [], []>} : vector<256x4xbf16>, vector<4x128xbf16>, vector<256x128xf32> -> vector<256x128xf32>
    %74 = arith.addf %66, %73 : vector<256x128xf32>
    %cst_50 = arith.constant dense<0.000000e+00> : vector<128xf32>
    %75 = vector.multi_reduction <add>, %74, %cst_50 [0] : vector<256x128xf32> to vector<128xf32>
    %76 = vector.shape_cast %75 : vector<128xf32> to vector<1x128xf32>
    %c0_51 = arith.constant 0 : index
    %c0_52 = arith.constant 0 : index
    %c0_53 = arith.constant 0 : index
    %77 = vector.load %arg5[%c0_51, %c0_52, %c0_53] : memref<1x2x128xf32, #tpu.memory_space<vmem>>, vector<1x1x128xf32>
    %78 = vector.shape_cast %77 : vector<1x1x128xf32> to vector<1x128xf32>
    %79 = vector.shape_cast %76 : vector<1x128xf32> to vector<1x1x128xf32>
    tpu.vector_store %arg5[%c0_51, %c0_52, %c0_53], %79 {strides = array<i32>} : memref<1x2x128xf32, #tpu.memory_space<vmem>>, vector<1x1x128xf32>,
    %80 = arith.mulf %74, %74 : vector<256x128xf32>
    %cst_54 = arith.constant dense<0.000000e+00> : vector<128xf32>
    %81 = vector.multi_reduction <add>, %80, %cst_54 [0] : vector<256x128xf32> to vector<128xf32>
    %82 = vector.shape_cast %81 : vector<128xf32> to vector<1x128xf32>
    %c0_55 = arith.constant 0 : index
    %c1 = arith.constant 1 : index
    %c0_56 = arith.constant 0 : index
    %83 = vector.load %arg5[%c0_55, %c1, %c0_56] : memref<1x2x128xf32, #tpu.memory_space<vmem>>, vector<1x1x128xf32>
    %84 = vector.shape_cast %83 : vector<1x1x128xf32> to vector<1x128xf32>
    %85 = vector.shape_cast %82 : vector<1x128xf32> to vector<1x1x128xf32>
    tpu.vector_store %arg5[%c0_55, %c1, %c0_56], %85 {strides = array<i32>} : memref<1x2x128xf32, #tpu.memory_space<vmem>>, vector<1x1x128xf32>,
    %86 = vector.shape_cast %74 : vector<256x128xf32> to vector<1x16x16x128xf32>
    %87 = arith.truncf %86 : vector<1x16x16x128xf32> to vector<1x16x16x128xbf16>
    %c0_57 = arith.constant 0 : index
    %c0_58 = arith.constant 0 : index
    %c0_59 = arith.constant 0 : index
    %c0_60 = arith.constant 0 : index
    %88 = vector.load %arg4[%c0_57, %c0_58, %c0_59, %c0_60] : memref<1x16x16x128xbf16, #tpu.memory_space<vmem>>, vector<1x16x16x128xbf16>
    tpu.vector_store %arg4[%c0_57, %c0_58, %c0_59, %c0_60], %87 {strides = array<i32>} : memref<1x16x16x128xbf16, #tpu.memory_space<vmem>>, vector<1x16x16x128xbf16>,
    return
  }
  func.func @transform_0(%arg0: i32, %arg1: i32) -> (i32, i32, i32, i32) {
    %c0_i32 = arith.constant 0 : i32
    %c0_i32_0 = arith.constant 0 : i32
    %c0_i32_1 = arith.constant 0 : i32
    %c0_i32_2 = arith.constant 0 : i32
    return %arg0, %c0_i32, %c0_i32_0, %c0_i32_1 : i32, i32, i32, i32
  }
  func.func @transform_1(%arg0: i32, %arg1: i32) -> (i32, i32) {
    %c0_i32 = arith.constant 0 : i32
    %c0_i32_0 = arith.constant 0 : i32
    %c0_i32_1 = arith.constant 0 : i32
    return %c0_i32, %c0_i32_0 : i32, i32
  }
  func.func @transform_2(%arg0: i32, %arg1: i32) -> (i32, i32, i32, i32) {
    %c0_i32 = arith.constant 0 : i32
    %c0_i32_0 = arith.constant 0 : i32
    %c0_i32_1 = arith.constant 0 : i32
    return %arg0, %arg1, %c0_i32, %c0_i32_0 : i32, i32, i32, i32
  }
  func.func @transform_3(%arg0: i32, %arg1: i32) -> (i32, i32, i32) {
    %c1_i32 = arith.constant 1 : i32
    %0 = arith.muli %arg0, %c1_i32 : i32
    %1 = arith.addi %0, %arg1 : i32
    %c0_i32 = arith.constant 0 : i32
    %c0_i32_0 = arith.constant 0 : i32
    %c0_i32_1 = arith.constant 0 : i32
    return %1, %c0_i32, %c0_i32_0 : i32, i32, i32
  }
}

</mosaic_0001>

<bundles_post_ra>
// kernel: tpu_custom_call.1
= control target key start
LH: loop header
LB: loop body
LE: loop exit
PB: predicated region body
PF: predicated region fallthrough
CT: control target
= control target key end

     0   :  { %9 = vsyncpa [#allocation3], 0  ;;  %s7606_s0 = inlined_call_operand.vmem [shape: bf16[2,20,20,4], index: 0, kind: input, shape index: {}]   ;;  %s7607_s1 = inlined_call_operand.vmem [shape: bf16[36,128], index: 1, kind: input, shape index: {}]   ;;  %s7608_s2 = inlined_call_operand.hbm [shape: bf16[2,16,16,128], index: 2, kind: output, shape index: {0}]   ;;  %s7609_s3 = inlined_call_operand.hbm [shape: f32[2,2,128], index: 3, kind: output, shape index: {1}]  }
   0x1   :  { %11 = vsyncpa [#allocation3 + $0x1], 0 }
   0x2   :  { %12 = vsyncpa [#allocation5], 0 }
   0x3   :  { %14 = vsyncpa [#allocation5 + $0x1], 0  ;;  %s6318_s12 = smov 0   ;;  %s6320_s13 = smov 0  }
   0x4   :  { %s6322_s14 = smov 0   ;;  %s6324_s15 = smov 0  }
   0x5   :  { %s6326_s16 = smov 0   ;;  %s6328_s17 = smov 0  }
   0x6 LB: > { %s4540_s18 = sadd.s32 4294967295, %s6292_s17   ;;  %s4541_s19 = sadd.s32 4294967294, %s6292_s17   ;;  %s6292_s17 = sphi %s6328_s17, %s20_s17   ;;  %s6288_s16 = sphi %s6326_s16, %s7620_s16   ;;  %s6284_s15 = sphi %s6324_s15, %s7619_s15   ;;  %s6280_s14 = sphi %s6322_s14, %s7618_s14   ;;  %s6276_s13 = sphi %s6320_s13, %s7617_s13   ;;  %s6272_s12 = sphi %s6318_s12, %s7616_s12  }
   0x7   : > { %s32_s20 = sadd.s32 1, %s6288_s16  ;;  %s88_s21 = sadd.s32 1, %s6280_s14 }
   0x8   : > { %p34_p0 = scmp.ge.s32.totalorder %s32_s20, 2  ;;  %p98_p1 = scmp.ne.s32.totalorder %s6280_s14, %s6276_s13 }
   0x9   : > { %p99_p2 = scmp.eq.s32.totalorder %s4540_s18, 1  ;;  %p104_p3 = scmp.ne.s32.totalorder %s6276_s13, %s6272_s12 }
   0xa   : > { %s7622_s20 = smov (%p34_p0, %s32_s20), 0  ;;  %p105_p5 = scmp.eq.s32.totalorder %s4541_s19, 1 }
   0xb   : > { %p6358_p4 = por %p99_p2, %p98_p1  ;;  %s83_s23 = ssub.s32 %s6288_s16, %s7622_s20 }
   0xc   : > { %p4544_p6 = scmp.ge.s32.totalorder %s6292_s17, 1  ;;  %p86_p7 = scmp.eq.s32.totalorder %s83_s23, 0 }
   0xd   : > { %p6365_p8 = por %p105_p5, %p104_p3  ;;  %p162_p9 = scmp.lt.s32.totalorder %s6292_s17, 3 }
   0xe   : > { %s6371_s25 = scalar_select %p86_p7, %s6280_s14, %s88_s21  }
   0xf   : > { %p163_p10 = pnand %p4544_p6, %p162_p9 }
  0x10   : > { %v6117_v0 = vld [vmem:[%s7607_s1] ss:$0 sps:$4 sm:$0xcc] (!%p163_p10)   ;;  %vm533_vm0 = vcmask (!%p163_p10), 1041408   ;;  %v2019_v1 = vld [vmem:[%s7607_s1 + $0x8] sm:$0x3] (!%p163_p10) }
  0x11   : > { %166 = sbr.rel (%p163_p10) target bundleno = 585 (0x249), region = 28  ;;  %p191_p11 = scmp.lt.s32.totalorder (!%p163_p10), %s6284_s15, 1  ;;  %v483_v2 = vrot.slane (!%p163_p10), %v6117_v0, 2  ;;  %6048 = vmatprep.subr.msk.bf16.mxu0 (!%p163_p10), %vm533_vm0, %v2019_v1  ;;  %v6382_v3 = vsel (!%p163_p10), %vm533_vm0, %v2019_v1, 0  ;;  %v235_v4 = vld [vmem:[%s7607_s1] sm:$0x3] (!%p163_p10) }
  0x12   : > { %5617 = vmatpush3.bf16.msra.mxu0 (!%p163_p10), %v6382_v3  ;;  %v6118_v5 = vld [vmem:[%s7607_s1 + $0x8] ss:$0 sps:$4 sm:$0xcc] (!%p163_p10)   ;;  %vm316_vm1 = vcmask (!%p163_p10), 1042432   ;;  %vm317_vm2 = vcmask (!%p163_p10), 1046532   ;;  %vm484_vm4 = vcmask (!%p163_p10), 31744  }
  0x13   : > { %6044 = vmatprep.subr.msk.bf16.mxu1 (!%p163_p10), %vm533_vm0, %v483_v2  ;;  %v535_v6 = vsel (!%p163_p10), %vm533_vm0, %v483_v2, 0  ;;  %v2540_v7 = vrot.slane (!%p163_p10), %v6118_v5, 2  ;;  %vm6400_vm3 = vmor (!%p163_p10), %vm316_vm1, %vm317_vm2  ;;  %v811_v37 = vsel (!%p163_p10), %vm533_vm0, %v235_v4, 0  ;;  %v6454_v51 = vld [vmem:[%s7607_s1 + $0x4] sm:$0x3] (!%p163_p10)  ;;  %vm1039_vm5 = vcmask (!%p163_p10), 1045508  }
  0x14   : > { %5481 = vmatpush3.bf16.msra.mxu1 (!%p163_p10), %v535_v6  ;;  %vm6606_vm6 = vmor (!%p163_p10), %vm533_vm0, %vm1039_vm5  ;;  %s7494_s7 = sand.u32 (!%p163_p10), 1, %s6276_s13   ;;  %s5231_s10 = sshll.u32 (!%p163_p10), %s6284_s15, 11 }
  0x15   : > { %6045 = vmatprep.subr.msk.bf16.mxu1 (!%p163_p10), %vm533_vm0, %v235_v4  ;;  %6050 = vmatprep.subr.msk.bf16.mxu0 (!%p163_p10), %vm533_vm0, %v2540_v7  ;;  %v2590_v42 = vsel (!%p163_p10), %vm533_vm0, %v2540_v7, 0  ;;  %s7523_s21 = scalar_lea.hbm (!%p163_p10), %s7608_s2, %s5231_s10  ;;  %s4389_s23 = scalar_lea.sflag (!%p163_p10), [#allocation3], %s7494_s7 }
  0x16   : > { %s6294_s27 = smov (!%p163_p10), [#allocation2]  }
  0x17   : > { %s6186_s28 = sshll.u32 (!%p163_p10), %s6294_s27, 4  ;;  %s6187_s28 = int_to_ptr.vmem [resolvable:$false] %s6186_s28 }
  0x18   : > { %s192_s5 = scalar_select %p191_p11, %s6284_s15, 1 }
  0x19   : > { %s6188_s29 = scalar_lea.vmem %s6187_s28, 4096 }
  0x1a   : > { %s6054_s8 = smul.u32 240, %s192_s5 }
  0x1c   : > { %s6398_s11 = scalar_lea.vmem %s7606_s0, %s6054_s8  ;;  %s4545_s8 = sshll.u32 %s7494_s7, 7 }
  0x1d   : > { %v6406_v9 = vld [vmem:[%s6398_s11 + $0x4] sm:$0xf]  ;;  %v236_v10 = vld [vmem:[%s6398_s11] sm:$0xe]  ;;  %v237_v11 = vld [vmem:[%s6398_s11 + $0x8] sm:$0x1] }
  0x1e   : > { %v4548_v12 = vrot.slane %v236_v10, 9  ;;  %v321_v13 = vrot.slane %v6406_v9, 5  ;;  %v324_v14 = vrot.slane %v237_v11, 5  ;;  %v4742_v15 = vld [vmem:[%s6398_s11 + $0x18] sm:$0xe]  ;;  %s7497_s9 = scalar_lea.vmem [#allocation2], %s4545_s8 }
  0x1f   : > { %v6413_v16 = vld [vmem:[%s6398_s11 + $0x1c] sm:$0xf]  ;;  %v4744_v17 = vld [vmem:[%s6398_s11 + $0x20] sm:$0x1]  ;;  %v4790_v18 = vrot.slane %v4742_v15, 9 }
  0x20   : > { %v322_v19 = vsel %vm6400_vm3, %v4548_v12, %v321_v13  ;;  %v323_v20 = vrot.slane %v321_v13, 4  ;;  %v1909_v21 = vrot.slane %v6413_v16, 5  ;;  %v1912_v22 = vrot.slane %v4744_v17, 5  ;;  %v6420_v23 = vld [vmem:[%s6398_s11 + $0x10] sm:$0xf] }
  0x21   : > { %v2378_v24 = vrot.slane %v6413_v16, 6  ;;  %v238_v25 = vld [vmem:[%s6398_s11 + $0xc] sm:$0xe]  ;;  %v239_v26 = vld [vmem:[%s6398_s11 + $0x14] sm:$0x1]  ;;  %v328_v27 = vrot.slane %v6420_v23, 5 }
  0x22   : > { %v325_v28 = vsel %vm6400_vm3, %v323_v20, %v324_v14  ;;  %v1910_v29 = vsel %vm6400_vm3, %v4790_v18, %v1909_v21  ;;  %v1911_v30 = vrot.slane %v1909_v21, 4  ;;  %v4549_v31 = vrot.slane %v238_v25, 9  ;;  %v4745_v32 = vld [vmem:[%s6398_s11 + $0x24] sm:$0xe]  ;;  %v6432_v33 = vld [vmem:[%s6398_s11 + $0x28] sm:$0xf] }
  0x23   : > { %v4564_v34 = vcombine.low %v322_v19, %v325_v28  ;;  %v330_v35 = vrot.slane %v328_v27, 4  ;;  %v331_v36 = vrot.slane %v239_v26, 5  ;;  %v4747_v38 = vld [vmem:[%s6398_s11 + $0x2c] sm:$0x1]  ;;  %v4791_v41 = vrot.slane %v4745_v32, 9 }
  0x24   : > { %v1913_v39 = vsel %vm6400_vm3, %v1911_v30, %v1912_v22  ;;  %v329_v40 = vsel %vm6400_vm3, %v4549_v31, %v328_v27  ;;  %v6442_v43 = vld [vmem:[%s6398_s11 + $0x1c] sm:$0xf]  ;;  %v240_v44 = vld [vmem:[%s6398_s11 + $0x18] sm:$0xe]  ;;  %v1916_v47 = vrot.slane %v6432_v33, 5  ;;  %v1919_v48 = vrot.slane %v4747_v38, 5 }
  0x25   : > { %5482 = vmatprep.mubr.msk.bf16.mxu1 %vm484_vm4, %v4564_v34  ;;  %v4806_v45 = vcombine.low %v1910_v29, %v1913_v39  ;;  %v332_v46 = vsel %vm6400_vm3, %v330_v35, %v331_v36  ;;  %v241_v49 = vld [vmem:[%s6398_s11 + $0x20] sm:$0x1]  ;;  %v4748_v50 = vld [vmem:[%s6398_s11 + $0x30] sm:$0xe]  ;;  %v6458_v52 = vrot.slane %v2378_v24, 4  ;;  %v2385_v54 = vrot.slane %v6432_v33, 6 }
  0x26   : > { %v4565_v53 = vcombine.low %v329_v40, %v332_v46  ;;  %v4550_v55 = vrot.slane %v240_v44, 9  ;;  %v6462_v56 = vld [vmem:[%s6398_s11 + $0x34] sm:$0xf]  ;;  %v1917_v57 = vsel %vm6400_vm3, %v4791_v41, %v1916_v47  ;;  %v1918_v58 = vrot.slane %v1916_v47, 4  ;;  %v4750_v61 = vld [vmem:[%s6398_s11 + $0x38] sm:$0x1] }
  0x27   : > { %5618 = vmatprep.mubr.msk.bf16.mxu0 %vm484_vm4, %v4806_v45  ;;  %v335_v59 = vrot.slane %v6442_v43, 5  ;;  %v338_v60 = vrot.slane %v241_v49, 5  ;;  %v6472_v62 = vrot.slane %v2385_v54, 4  ;;  %v4792_v63 = vrot.slane %v4748_v50, 9  ;;  %v6476_v2 = vld [vmem:[%s6398_s11 + $0x28] sm:$0xf] }
  0x28   : > { %5483 = vmatmul.mubr.msk.bf16.vlgmr.msra.gmra.mrb[0].mxu1 %vm484_vm4, %v4565_v53  ;;  %v1923_v0 = vrot.slane %v6462_v56, 5  ;;  %v1926_v1 = vrot.slane %v4750_v61, 5  ;;  %v1920_v4 = vsel %vm6400_vm3, %v1918_v58, %v1919_v48  ;;  %v242_v7 = vld [vmem:[%s6398_s11 + $0x24] sm:$0xe]  ;;  %v243_v10 = vld [vmem:[%s6398_s11 + $0x2c] sm:$0x1] }
  0x29   : > { %5515 = vmatpush3.bf16.msra.mxu1 %v811_v37  ;;  %v336_v5 = vsel %vm6400_vm3, %v4550_v55, %v335_v59  ;;  %v337_v6 = vrot.slane %v335_v59, 4  ;;  %v342_v11 = vrot.slane %v6476_v2, 5  ;;  %v6488_v12 = vld [vmem:[%s7607_s1 + $0xc] sm:$0x3]  ;;  %v4807_v13 = vcombine.low %v1917_v57, %v1920_v4  ;;  %v4751_v18 = vld [vmem:[%s6398_s11 + $0x3c] sm:$0xe] }
  0x2a   : > { %v1924_v14 = vsel %vm6400_vm3, %v4792_v63, %v1923_v0  ;;  %v1925_v15 = vrot.slane %v1923_v0, 4  ;;  %v4551_v17 = vrot.slane %v242_v7, 9  ;;  %v6494_v19 = vld [vmem:[%s6398_s11 + $0x40] sm:$0xf]  ;;  %6046 = vmatprep.subr.msk.bf16.mxu1 %vm533_vm0, %v6454_v51  ;;  %v345_v22 = vrot.slane %v243_v10, 5 }
  0x2b   : > { %v339_v20 = vsel %vm6400_vm3, %v337_v6, %v338_v60  ;;  %v344_v21 = vrot.slane %v342_v11, 4  ;;  %v4753_v25 = vld [vmem:[%s6398_s11 + $0x44] sm:$0x1]  ;;  %v4793_v26 = vrot.slane %v4751_v18, 9  ;;  %5619 = vmatmul.mubr.msk.bf16.vlgmr.msra.gmra.mrb[0].mxu0 %vm484_vm4, %v4807_v13  ;;  %v1930_v30 = vrot.slane %v6494_v19, 5 }
  0x2c   : > { %v4566_v27 = vcombine.low %v336_v5, %v339_v20  ;;  %v1927_v28 = vsel %vm6400_vm3, %v1925_v15, %v1926_v1  ;;  %v343_v29 = vsel %vm6400_vm3, %v4551_v17, %v342_v11  ;;  %v6508_v31 = vld [vmem:[%s6398_s11 + $0x34] sm:$0xf]  ;;  %v244_v32 = vld [vmem:[%s6398_s11 + $0x30] sm:$0xe]  ;;  %5651 = vmatpush3.bf16.msra.mxu0 %v2590_v42  ;;  %v1933_v36 = vrot.slane %v4753_v25, 5 }
  0x2d   : > { %v4808_v34 = vcombine.low %v1924_v14, %v1927_v28  ;;  %v346_v35 = vsel %vm6400_vm3, %v344_v21, %v345_v22  ;;  %v245_v37 = vld [vmem:[%s6398_s11 + $0x38] sm:$0x1]  ;;  %v4552_v38 = vrot.slane %v244_v32, 9  ;;  %v4754_v39 = vld [vmem:[%s6398_s11 + $0x48] sm:$0xe]  ;;  %v1931_v41 = vsel %vm6400_vm3, %v4793_v26, %v1930_v30  ;;  %6051 = vmatprep.subr.msk.bf16.mxu0 %vm533_vm0, %v6488_v12 }
  0x2e   : > { %5486 = vmatprep.mubr.msk.bf16.mxu1 %vm484_vm4, %v4566_v27  ;;  %v4567_v40 = vcombine.low %v343_v29, %v346_v35  ;;  %v1932_v44 = vrot.slane %v1930_v30, 4  ;;  %v349_v42 = vrot.slane %v6508_v31, 5  ;;  %v6520_v45 = vld [vmem:[%s6398_s11 + $0x4c] sm:$0xf]  ;;  %v4756_v46 = vld [vmem:[%s6398_s11 + $0x50] sm:$0x1] }
  0x2f   : > { %5622 = vmatprep.mubr.msk.bf16.mxu0 %vm484_vm4, %v4808_v34  ;;  %v352_v47 = vrot.slane %v245_v37, 5  ;;  %v4794_v48 = vrot.slane %v4754_v39, 9  ;;  %v1937_v49 = vrot.slane %v6520_v45, 5  ;;  %v1940_v50 = vrot.slane %v4756_v46, 5  ;;  %v6528_v53 = vld [vmem:[%s6398_s11 + $0x40] sm:$0xf] }
  0x30   : > { %5487 = vmatmul.mubr.msk.bf16.gmra.mrb[4].mxu1 %vm484_vm4, %v4567_v40  ;;  %v1934_v55 = vsel %vm6400_vm3, %v1932_v44, %v1933_v36  ;;  %v350_v57 = vsel %vm6400_vm3, %v4552_v38, %v349_v42  ;;  %v351_v58 = vrot.slane %v349_v42, 4  ;;  %v246_v59 = vld [vmem:[%s6398_s11 + $0x3c] sm:$0xe]  ;;  %v247_v60 = vld [vmem:[%s6398_s11 + $0x44] sm:$0x1]  ;;  %v356_v61 = vrot.slane %v6528_v53, 5 }
  0x31   : > { %v4809_v63 = vcombine.low %v1931_v41, %v1934_v55  ;;  %v1938_v0 = vsel %vm6400_vm3, %v4794_v48, %v1937_v49  ;;  %v1939_v1 = vrot.slane %v1937_v49, 4  ;;  %v4553_v4 = vrot.slane %v246_v59, 9  ;;  %v4757_v5 = vld [vmem:[%s6398_s11 + $0x54] sm:$0xe]  ;;  %v6542_v6 = vld [vmem:[%s6398_s11 + $0x58] sm:$0xf] }
  0x32   : > { %v353_v7 = vsel %vm6400_vm3, %v351_v58, %v352_v47  ;;  %v358_v10 = vrot.slane %v356_v61, 4  ;;  %v359_v11 = vrot.slane %v247_v60, 5  ;;  %v4759_v13 = vld [vmem:[%s6398_s11 + $0x5c] sm:$0x1]  ;;  %v4795_v14 = vrot.slane %v4757_v5, 9 }
  0x33   : > { %v4568_v15 = vcombine.low %v350_v57, %v353_v7  ;;  %v1941_v17 = vsel %vm6400_vm3, %v1939_v1, %v1940_v50  ;;  %v357_v18 = vsel %vm6400_vm3, %v4553_v4, %v356_v61  ;;  %v1944_v20 = vrot.slane %v6542_v6, 5  ;;  %v6553_v21 = vld [vmem:[%s6398_s11 + $0x4c] sm:$0xf]  ;;  %v248_v22 = vld [vmem:[%s6398_s11 + $0x48] sm:$0xe]  ;;  %5623 = vmatmul.mubr.msk.bf16.gmra.mrb[4].mxu0 %vm484_vm4, %v4809_v63 }
  0x34   : > { %v4810_v25 = vcombine.low %v1938_v0, %v1941_v17  ;;  %v360_v26 = vsel %vm6400_vm3, %v358_v10, %v359_v11  ;;  %v1947_v27 = vrot.slane %v4759_v13, 5  ;;  %v249_v28 = vld [vmem:[%s6398_s11 + $0x50] sm:$0x1]  ;;  %v4554_v29 = vrot.slane %v248_v22, 9  ;;  %v4760_v30 = vld [vmem:[%s6398_s11 + $0x60] sm:$0xe] }
  0x35   : > { %5490 = vmatprep.mubr.msk.bf16.mxu1 %vm484_vm4, %v4568_v15  ;;  %v4569_v32 = vcombine.low %v357_v18, %v360_v26  ;;  %v1945_v34 = vsel %vm6400_vm3, %v4795_v14, %v1944_v20  ;;  %v1946_v35 = vrot.slane %v1944_v20, 4  ;;  %v363_v36 = vrot.slane %v6553_v21, 5  ;;  %v6566_v37 = vld [vmem:[%s6398_s11 + $0x64] sm:$0xf]  ;;  %v4762_v38 = vld [vmem:[%s6398_s11 + $0x68] sm:$0x1] }
  0x36   : > { %5626 = vmatprep.mubr.msk.bf16.mxu0 %vm484_vm4, %v4810_v25  ;;  %v366_v39 = vrot.slane %v249_v28, 5  ;;  %v4796_v40 = vrot.slane %v4760_v30, 9  ;;  %v1951_v41 = vrot.slane %v6566_v37, 5  ;;  %v1954_v44 = vrot.slane %v4762_v38, 5  ;;  %v6572_v42 = vld [vmem:[%s6398_s11 + $0x58] sm:$0xf] }
  0x37   : > { %v1948_v46 = vsel %vm6400_vm3, %v1946_v35, %v1947_v27  ;;  %v364_v47 = vsel %vm6400_vm3, %v4554_v29, %v363_v36  ;;  %v365_v48 = vrot.slane %v363_v36, 4  ;;  %v250_v49 = vld [vmem:[%s6398_s11 + $0x54] sm:$0xe]  ;;  %v251_v50 = vld [vmem:[%s6398_s11 + $0x5c] sm:$0x1]  ;;  %v370_v55 = vrot.slane %v6572_v42, 5 }
  0x38   : > { %5491 = vmatmul.mubr.msk.bf16.gmra.mrb[8].mxu1 %vm484_vm4, %v4569_v32  ;;  %v4811_v57 = vcombine.low %v1945_v34, %v1948_v46  ;;  %v1952_v58 = vsel %vm6400_vm3, %v4796_v40, %v1951_v41  ;;  %v1953_v59 = vrot.slane %v1951_v41, 4  ;;  %v4555_v60 = vrot.slane %v250_v49, 9  ;;  %v4763_v61 = vld [vmem:[%s6398_s11 + $0x6c] sm:$0xe]  ;;  %v6586_v63 = vld [vmem:[%s6398_s11 + $0x70] sm:$0xf] }
  0x39   : > { %v367_v0 = vsel %vm6400_vm3, %v365_v48, %v366_v39  ;;  %v372_v1 = vrot.slane %v370_v55, 4  ;;  %v373_v4 = vrot.slane %v251_v50, 5  ;;  %v4765_v5 = vld [vmem:[%s6398_s11 + $0x74] sm:$0x1]  ;;  %v4797_v7 = vrot.slane %v4763_v61, 9 }
  0x3a   : > { %v4570_v10 = vcombine.low %v364_v47, %v367_v0  ;;  %v1955_v11 = vsel %vm6400_vm3, %v1953_v59, %v1954_v44  ;;  %v371_v13 = vsel %vm6400_vm3, %v4555_v60, %v370_v55  ;;  %v1958_v14 = vrot.slane %v6586_v63, 5  ;;  %v6597_v15 = vld [vmem:[%s6398_s11 + $0x64] sm:$0xf]  ;;  %v252_v17 = vld [vmem:[%s6398_s11 + $0x60] sm:$0xe] }
  0x3b   : > { %v4812_v18 = vcombine.low %v1952_v58, %v1955_v11  ;;  %v374_v20 = vsel %vm6400_vm3, %v372_v1, %v373_v4  ;;  %v1961_v22 = vrot.slane %v4765_v5, 5  ;;  %v253_v25 = vld [vmem:[%s6398_s11 + $0x68] sm:$0x1]  ;;  %v4556_v26 = vrot.slane %v252_v17, 9  ;;  %v4838_v27 = vld [vmem:[%s6398_s11 + $0x18] sm:$0xc]  ;;  %5627 = vmatmul.mubr.msk.bf16.gmra.mrb[8].mxu0 %vm484_vm4, %v4811_v57 }
  0x3c   : > { %5494 = vmatprep.mubr.msk.bf16.mxu1 %vm484_vm4, %v4570_v10  ;;  %v4571_v29 = vcombine.low %v371_v13, %v374_v20  ;;  %v1959_v30 = vsel %vm6400_vm3, %v4797_v7, %v1958_v14  ;;  %v1960_v32 = vrot.slane %v1958_v14, 4  ;;  %v377_v34 = vrot.slane %v6597_v15, 5  ;;  %v4839_v35 = vld [vmem:[%s6398_s11 + $0x20] sm:$0x3]  ;;  %v6617_v36 = vld [vmem:[%s6398_s11 + $0x70] sm:$0xf] }
  0x3d   : > { %5630 = vmatprep.mubr.msk.bf16.mxu0 %vm484_vm4, %v4812_v18  ;;  %v380_v38 = vrot.slane %v253_v25, 5  ;;  %v4870_v39 = vrot.slane %v4838_v27, 10  ;;  %v2381_v40 = vrot.slane %v4839_v35, 6  ;;  %v254_v41 = vld [vmem:[%s6398_s11 + $0x6c] sm:$0xe]  ;;  %v384_v44 = vrot.slane %v6617_v36, 5 }
  0x3e   : > { %v1962_v46 = vsel %vm6400_vm3, %v1960_v32, %v1961_v22  ;;  %v378_v47 = vsel %vm6400_vm3, %v4556_v26, %v377_v34  ;;  %v379_v48 = vrot.slane %v377_v34, 4  ;;  %v255_v49 = vld [vmem:[%s6398_s11 + $0x74] sm:$0x1]  ;;  %v4557_v50 = vrot.slane %v254_v41, 9  ;;  %v4840_v55 = vld [vmem:[%s6398_s11 + $0x24] sm:$0xc] }
  0x3f   : > { %v4813_v57 = vcombine.low %v1959_v30, %v1962_v46  ;;  %v2379_v58 = vsel %vm6606_vm6, %v4870_v39, %v2378_v24  ;;  %v2382_v59 = vsel %vm6606_vm6, %v6458_v52, %v2381_v40  ;;  %v386_v60 = vrot.slane %v384_v44, 4  ;;  %v4841_v61 = vld [vmem:[%s6398_s11 + $0x2c] sm:$0x3]  ;;  %v6637_v0 = vld [vmem:[%s6398_s11 + $0x7c] sm:$0xf] }
  0x40   : > { %5495 = vmatmul.mubr.msk.bf16.gmra.mrb[12].mxu1 %vm484_vm4, %v4571_v29  ;;  %v381_v1 = vsel %vm6400_vm3, %v379_v48, %v380_v38  ;;  %v4886_v4 = vcombine.low %v2379_v58, %v2382_v59  ;;  %v385_v16 = vsel %vm6400_vm3, %v4557_v50, %v384_v44  ;;  %v387_v24 = vrot.slane %v255_v49, 5  ;;  %v256_v5 = vld [vmem:[%s6398_s11 + $0x78] sm:$0xe]  ;;  %v257_v7 = vld [vmem:[%s6398_s11 + $0x80] sm:$0x1] }
  0x41   : > { %v4572_v10 = vcombine.low %v378_v47, %v381_v1  ;;  %v4871_v52 = vrot.slane %v4840_v55, 10  ;;  %v2388_v11 = vrot.slane %v4841_v61, 6  ;;  %v4558_v13 = vrot.slane %v256_v5, 9  ;;  %v4842_v14 = vld [vmem:[%s6398_s11 + $0x30] sm:$0xc] }
  0x42   : > { %v388_v17 = vsel %vm6400_vm3, %v386_v60, %v387_v24  ;;  %v391_v18 = vrot.slane %v6637_v0, 5  ;;  %v394_v20 = vrot.slane %v257_v7, 5  ;;  %v4843_v22 = vld [vmem:[%s6398_s11 + $0x38] sm:$0x3]  ;;  %v4872_v25 = vrot.slane %v4842_v14, 10 }
  0x43   : > { %5498 = vmatprep.mubr.msk.bf16.mxu1 %vm484_vm4, %v4572_v10  ;;  %v4573_v26 = vcombine.low %v385_v16, %v388_v17  ;;  %v2386_v27 = vsel %vm6606_vm6, %v4871_v52, %v2385_v54  ;;  %v2951_v29 = vsel %vm533_vm0, %v6488_v12, 0  ;;  %v2392_v30 = vrot.slane %v6462_v56, 6  ;;  %v6660_v32 = vld [vmem:[%s6398_s11 + $0x88] sm:$0xf]  ;;  %v258_v34 = vld [vmem:[%s6398_s11 + $0x84] sm:$0xe]  ;;  %5631 = vmatmul.mubr.msk.bf16.gmra.mrb[12].mxu0 %vm484_vm4, %v4813_v57 }
  0x44   : > { %v2389_v35 = vsel %vm6606_vm6, %v6472_v62, %v2388_v11  ;;  %v392_v33 = vsel %vm6400_vm3, %v4558_v13, %v391_v18  ;;  %v393_v54 = vrot.slane %v391_v18, 4  ;;  %v2395_v38 = vrot.slane %v4843_v22, 6  ;;  %v259_v39 = vld [vmem:[%s6398_s11 + $0x8c] sm:$0x1]  ;;  %v4844_v12 = vld [vmem:[%s6398_s11 + $0x3c] sm:$0xc]  ;;  %5652 = vmatprep.mubr.msk.bf16.mxu0 %vm484_vm4, %v4886_v4 }
  0x45   : > { %v2393_v56 = vsel %vm6606_vm6, %v4872_v25, %v2392_v30  ;;  %v2394_v40 = vrot.slane %v2392_v30, 4  ;;  %v4559_v41 = vrot.slane %v258_v34, 9  ;;  %v398_v44 = vrot.slane %v6660_v32, 5  ;;  %v4845_v62 = vld [vmem:[%s6398_s11 + $0x44] sm:$0x3] }
  0x46   : > { %v395_v46 = vsel %vm6400_vm3, %v393_v54, %v394_v20  ;;  %v401_v47 = vrot.slane %v259_v39, 5  ;;  %v4873_v48 = vrot.slane %v4844_v12, 10  ;;  %v2399_v49 = vrot.slane %v6494_v19, 6  ;;  %v6680_v50 = vld [vmem:[%s6398_s11 + $0x94] sm:$0xf] }
  0x47   : > { %v4887_v55 = vcombine.low %v2386_v27, %v2389_v35  ;;  %v4574_v57 = vcombine.low %v392_v33, %v395_v46  ;;  %v2396_v58 = vsel %vm6606_vm6, %v2394_v40, %v2395_v38  ;;  %v400_v59 = vrot.slane %v398_v44, 4  ;;  %v260_v60 = vld [vmem:[%s6398_s11 + $0x90] sm:$0xe]  ;;  %v261_v61 = vld [vmem:[%s6398_s11 + $0x98] sm:$0x1] }
  0x48   : > { %5499 = vmatmul.mubr.msk.bf16.gmra.mrb[16].mxu1 %vm484_vm4, %v4573_v26  ;;  %v4888_v1 = vcombine.low %v2393_v56, %v2396_v58  ;;  %v399_v4 = vsel %vm6400_vm3, %v4559_v41, %v398_v44  ;;  %v2401_v19 = vrot.slane %v2399_v49, 4  ;;  %v2402_v16 = vrot.slane %v4845_v62, 6  ;;  %v4846_v24 = vld [vmem:[%s6398_s11 + $0x48] sm:$0xc]  ;;  %v4847_v5 = vld [vmem:[%s6398_s11 + $0x50] sm:$0x3] }
  0x49   : > { %5502 = vmatprep.mubr.msk.bf16.mxu1 %vm484_vm4, %v4574_v57  ;;  %v402_v7 = vsel %vm6400_vm3, %v400_v59, %v401_v47  ;;  %v4560_v10 = vrot.slane %v260_v60, 9  ;;  %v405_v52 = vrot.slane %v6680_v50, 5  ;;  %v408_v11 = vrot.slane %v261_v61, 5  ;;  %v6696_v13 = vld [vmem:[%s6398_s11 + $0xa0] sm:$0xf] }
  0x4a   : > { %v2400_v14 = vsel %vm6606_vm6, %v4873_v48, %v2399_v49  ;;  %v4874_v17 = vrot.slane %v4846_v24, 10  ;;  %v2406_v18 = vrot.slane %v6520_v45, 6  ;;  %v262_v20 = vld [vmem:[%s6398_s11 + $0x9c] sm:$0xe]  ;;  %v263_v22 = vld [vmem:[%s6398_s11 + $0xa4] sm:$0x1]  ;;  %v4575_v25 = vcombine.low %v399_v4, %v402_v7 }
  0x4b   : > { %v406_v26 = vsel %vm6400_vm3, %v4560_v10, %v405_v52  ;;  %v407_v27 = vrot.slane %v405_v52, 4  ;;  %v2409_v30 = vrot.slane %v4847_v5, 6  ;;  %v4848_v34 = vld [vmem:[%s6398_s11 + $0x54] sm:$0xc]  ;;  %5653 = vmatmul.mubr.msk.bf16.vlgmr.msra.gmra.mrb[0].mxu0 %vm484_vm4, %v4887_v55  ;;  %v2403_v35 = vsel %vm6606_vm6, %v2401_v19, %v2402_v16  ;;  %v4849_v38 = vld [vmem:[%s6398_s11 + $0x5c] sm:$0x3] }
  0x4c   : > { %v2408_v33 = vrot.slane %v2406_v18, 4  ;;  %v4561_v54 = vrot.slane %v262_v20, 9  ;;  %v412_v45 = vrot.slane %v6696_v13, 5  ;;  %5685 = vmatpush3.bf16.msra.mxu0 %v2951_v29  ;;  %5656 = vmatprep.mubr.msk.bf16.mxu0 %vm484_vm4, %v4888_v1  ;;  %v415_v12 = vrot.slane %v263_v22, 5  ;;  %v6716_v40 = vld [vmem:[%s6398_s11 + $0xac] sm:$0xf] }
  0x4d   : > { %v409_v39 = vsel %vm6400_vm3, %v407_v27, %v408_v11  ;;  %v2413_v56 = vrot.slane %v6542_v6, 6  ;;  %v264_v41 = vld [vmem:[%s6398_s11 + $0xa8] sm:$0xe]  ;;  %v2407_v62 = vsel %vm6606_vm6, %v4874_v17, %v2406_v18  ;;  %v265_v47 = vld [vmem:[%s6398_s11 + $0xb0] sm:$0x1]  ;;  %v4889_v48 = vcombine.low %v2400_v14, %v2403_v35 }
  0x4e   : > { %v4576_v44 = vcombine.low %v406_v26, %v409_v39  ;;  %v2410_v29 = vsel %vm6606_vm6, %v2408_v33, %v2409_v30  ;;  %v414_v46 = vrot.slane %v412_v45, 4  ;;  %v4875_v49 = vrot.slane %v4848_v34, 10  ;;  %v4850_v57 = vld [vmem:[%s6398_s11 + $0x60] sm:$0xc]  ;;  %v4851_v58 = vld [vmem:[%s6398_s11 + $0x68] sm:$0x3] }
  0x4f   : > { %v2415_v55 = vrot.slane %v2413_v56, 4  ;;  %v2416_v6 = vrot.slane %v4849_v38, 6  ;;  %v4562_v59 = vrot.slane %v264_v41, 9  ;;  %v419_v60 = vrot.slane %v6716_v40, 5  ;;  %v6729_v1 = vld [vmem:[%s6398_s11 + $0xb8] sm:$0xf] }
  0x50   : > { %5503 = vmatmul.mubr.msk.bf16.gmra.mrb[20].mxu1 %vm484_vm4, %v4575_v25  ;;  %v422_v61 = vrot.slane %v265_v47, 5  ;;  %v4890_v4 = vcombine.low %v2407_v62, %v2410_v29  ;;  %v413_v19 = vsel %vm6400_vm3, %v4561_v54, %v412_v45  ;;  %v416_v16 = vsel %vm6400_vm3, %v414_v46, %v415_v12  ;;  %v266_v5 = vld [vmem:[%s6398_s11 + $0xb4] sm:$0xe]  ;;  %v267_v14 = vld [vmem:[%s6398_s11 + $0xbc] sm:$0x1] }
  0x51   : > { %5506 = vmatprep.mubr.msk.bf16.mxu1 %vm484_vm4, %v4576_v44  ;;  %v2420_v24 = vrot.slane %v6566_v37, 6  ;;  %v420_v7 = vsel %vm6400_vm3, %v4562_v59, %v419_v60  ;;  %v421_v10 = vrot.slane %v419_v60, 4  ;;  %v4876_v52 = vrot.slane %v4850_v57, 10  ;;  %v4767_v27 = vld [vmem:[%s6398_s11 + $0x7c] sm:$0xf] }
  0x52   : > { %v2423_v11 = vrot.slane %v4851_v58, 6  ;;  %v2414_v17 = vsel %vm6606_vm6, %v4875_v49, %v2413_v56  ;;  %v426_v20 = vrot.slane %v6729_v1, 5  ;;  %v4577_v37 = vcombine.low %v413_v19, %v416_v16  ;;  %v4852_v33 = vld [vmem:[%s6398_s11 + $0x6c] sm:$0xc]  ;;  %v4853_v39 = vld [vmem:[%s6398_s11 + $0x74] sm:$0x3] }
  0x53   : > { %v2422_v18 = vrot.slane %v2420_v24, 4  ;;  %5657 = vmatmul.mubr.msk.bf16.gmra.mrb[4].mxu0 %vm484_vm4, %v4889_v48  ;;  %v2417_v22 = vsel %vm6606_vm6, %v2415_v55, %v2416_v6  ;;  %v423_v25 = vsel %vm6400_vm3, %v421_v10, %v422_v61  ;;  %v4563_v26 = vrot.slane %v266_v5, 9  ;;  %v4854_v12 = vld [vmem:[%s6398_s11 + $0x78] sm:$0xc]  ;;  %v4855_v56 = vld [vmem:[%s6398_s11 + $0x80] sm:$0x3] }
  0x54   : > { %5660 = vmatprep.mubr.msk.bf16.mxu0 %vm484_vm4, %v4890_v4  ;;  %v4578_v30 = vcombine.low %v420_v7, %v423_v25  ;;  %v428_v34 = vrot.slane %v426_v20, 4  ;;  %v429_v35 = vrot.slane %v267_v14, 5  ;;  %v2427_v54 = vrot.slane %v6586_v63, 6  ;;  %v203_v49 = vld [vmem:[%s6398_s11] sm:$0xf] }
  0x55   : > { %v2421_v45 = vsel %vm6606_vm6, %v4876_v52, %v2420_v24  ;;  %v2424_v38 = vsel %vm6606_vm6, %v2422_v18, %v2423_v11  ;;  %v2434_v41 = vrot.slane %v4767_v27, 6  ;;  %v4891_v44 = vcombine.low %v2414_v17, %v2417_v22  ;;  %v4770_v6 = vld [vmem:[%s6398_s11 + $0x88] sm:$0xf]  ;;  %v4773_v59 = vld [vmem:[%s6398_s11 + $0x94] sm:$0xf] }
  0x56   : > { %v427_v62 = vsel %vm6400_vm3, %v4563_v26, %v426_v20  ;;  %v4877_v63 = vrot.slane %v4852_v33, 10  ;;  %v4892_v29 = vcombine.low %v2421_v45, %v2424_v38  ;;  %v430_v46 = vsel %vm6400_vm3, %v428_v34, %v429_v35  ;;  %v4856_v7 = vld [vmem:[%s6398_s11 + $0x84] sm:$0xc]  ;;  %v4857_v10 = vld [vmem:[%s6398_s11 + $0x8c] sm:$0x3] }
  0x57   : > { %v2429_v47 = vrot.slane %v2427_v54, 4  ;;  %v2430_v48 = vrot.slane %v4853_v39, 6  ;;  %v4878_v55 = vrot.slane %v4854_v12, 10  ;;  %v2436_v57 = vrot.slane %v2434_v41, 4  ;;  %v4858_v11 = vld [vmem:[%s6398_s11 + $0x90] sm:$0xc] }
  0x58   : > { %5507 = vmatmul.mubr.msk.bf16.gmra.mrb[24].mxu1 %vm484_vm4, %v4577_v37  ;;  %v2437_v58 = vrot.slane %v4855_v56, 6  ;;  %v4579_v60 = vcombine.low %v427_v62, %v430_v46  ;;  %v2428_v61 = vsel %vm6606_vm6, %v4877_v63, %v2427_v54  ;;  %v4597_v19 = vcombine.low %v203_v49, %v6406_v9  ;;  %v4859_v14 = vld [vmem:[%s6398_s11 + $0x98] sm:$0x3]  ;;  %v205_v9 = vld [vmem:[%s6398_s11 + $0xc] sm:$0xf] }
  0x59   : > { %5510 = vmatprep.mubr.msk.bf16.mxu1 %vm484_vm4, %v4578_v30  ;;  %v2431_v4 = vsel %vm6606_vm6, %v2429_v47, %v2430_v48  ;;  %v2441_v16 = vrot.slane %v4770_v6, 6  ;;  %v2435_v24 = vsel %vm6606_vm6, %v4878_v55, %v2434_v41  ;;  %v2448_v52 = vrot.slane %v4773_v59, 6  ;;  %v207_v25 = vld [vmem:[%s6398_s11 + $0x18] sm:$0xf]  ;;  %v4776_v34 = vld [vmem:[%s6398_s11 + $0xa0] sm:$0xf] }
  0x5a   : > { %v2438_v5 = vsel %vm6606_vm6, %v2436_v57, %v2437_v58  ;;  %v4893_v17 = vcombine.low %v2428_v61, %v2431_v4  ;;  %v4879_v20 = vrot.slane %v4856_v7, 10  ;;  %v2444_v22 = vrot.slane %v4857_v10, 6  ;;  %v4779_v35 = vld [vmem:[%s6398_s11 + $0xac] sm:$0xf]  ;;  %v4860_v45 = vld [vmem:[%s6398_s11 + $0x9c] sm:$0xc] }
  0x5b   : > { %5661 = vmatmul.mubr.msk.bf16.gmra.mrb[8].mxu0 %vm484_vm4, %v4891_v44  ;;  %v4894_v18 = vcombine.low %v2435_v24, %v2438_v5  ;;  %v2443_v37 = vrot.slane %v2441_v16, 4  ;;  %v4880_v26 = vrot.slane %v4858_v11, 10  ;;  %v2450_v27 = vrot.slane %v2448_v52, 4  ;;  %v6793_v33 = vld [vmem:[%s7607_s1 + $0xc] ss:$0 sps:$4 sm:$0xcc]  }
  0x5c   : > { %5664 = vmatprep.mubr.msk.bf16.mxu0 %vm484_vm4, %v4892_v29  ;;  %v2451_v30 = vrot.slane %v4859_v14, 6  ;;  %v4598_v54 = vcombine.low %v205_v9, %v6420_v23  ;;  %v4861_v38 = vld [vmem:[%s6398_s11 + $0xa4] sm:$0x3]  ;;  %v2442_v39 = vsel %vm6606_vm6, %v4879_v20, %v2441_v16  ;;  %v4599_v56 = vcombine.low %v207_v25, %v6442_v43  ;;  %v4862_v63 = vld [vmem:[%s6398_s11 + $0xa8] sm:$0xc] }
  0x5d   : > { %v2445_v12 = vsel %vm6606_vm6, %v2443_v37, %v2444_v22  ;;  %v2455_v41 = vrot.slane %v4776_v34, 6  ;;  %v1251_v44 = vsel %vm533_vm0, %v6454_v51, 0  ;;  %v2449_v23 = vsel %vm6606_vm6, %v4880_v26, %v2448_v52  ;;  %v209_v46 = vld [vmem:[%s6398_s11 + $0x24] sm:$0xf]  ;;  %v4863_v47 = vld [vmem:[%s6398_s11 + $0xb0] sm:$0x3] }
  0x5e   : > { %v2452_v62 = vsel %vm6606_vm6, %v2450_v27, %v2451_v30  ;;  %v2462_v29 = vrot.slane %v4779_v35, 6  ;;  %v3406_v48 = vrot.slane %v6793_v33, 2  ;;  %v4895_v43 = vcombine.low %v2442_v39, %v2445_v12  ;;  %v211_v55 = vld [vmem:[%s6398_s11 + $0x30] sm:$0xf]  ;;  %v4782_v59 = vld [vmem:[%s6398_s11 + $0xb8] sm:$0xf] }
  0x5f   : > { %v4881_v49 = vrot.slane %v4860_v45, 10  ;;  %v2458_v51 = vrot.slane %v4861_v38, 6  ;;  %v4896_v57 = vcombine.low %v2449_v23, %v2452_v62  ;;  %v2457_v58 = vrot.slane %v2455_v41, 4  ;;  %v4864_v4 = vld [vmem:[%s6398_s11 + $0xb4] sm:$0xc] }
  0x60   : > { %5511 = vmatmul.mubr.msk.bf16.gmra.mrb[28].mxu1 %vm484_vm4, %v4579_v60  ;;  %v4882_v6 = vrot.slane %v4862_v63, 10  ;;  %v2464_v60 = vrot.slane %v2462_v29, 4  ;;  %v2465_v61 = vrot.slane %v4863_v47, 6  ;;  %6052 = vmatprep.subr.msk.bf16.mxu0 %vm533_vm0, %v3406_v48  ;;  %v4600_v16 = vcombine.low %v209_v46, %v6476_v2  ;;  %v4865_v24 = vld [vmem:[%s6398_s11 + $0xbc] sm:$0x3] }
  0x61   : > { %5516 = vmatprep.mubr.msk.bf16.mxu1 %vm484_vm4, %v4597_v19  ;;  %v4785_v19 = vld [vmem:[%s6398_s11 + $0xc4] sm:$0xf]  ;;  %v2456_v5 = vsel %vm6606_vm6, %v4881_v49, %v2455_v41  ;;  %v2459_v7 = vsel %vm6606_vm6, %v2457_v58, %v2458_v51  ;;  %v4601_v10 = vcombine.low %v211_v55, %v6508_v31  ;;  %v2469_v52 = vrot.slane %v4782_v59, 6  ;;  %v4866_v2 = vld [vmem:[%s6398_s11 + $0xc0] sm:$0xc] }
  0x62   : > { %v2463_v11 = vsel %vm6606_vm6, %v4882_v6, %v2462_v29  ;;  %v2466_v14 = vsel %vm6606_vm6, %v2464_v60, %v2465_v61  ;;  %v213_v9 = vld [vmem:[%s6398_s11 + $0x3c] sm:$0xf]  ;;  %v6843_v20 = vld [vmem:[%s7607_s1 + $0x4] ss:$0 sps:$4 sm:$0xcc]   ;;  %v4897_v37 = vcombine.low %v2456_v5, %v2459_v7  ;;  %v4883_v22 = vrot.slane %v4864_v4, 10 }
  0x63   : > { %5665 = vmatmul.mubr.msk.bf16.gmra.mrb[12].mxu0 %vm484_vm4, %v4893_v17  ;;  %v2476_v17 = vrot.slane %v4785_v19, 6  ;;  %v2472_v25 = vrot.slane %v4865_v24, 6  ;;  %v215_v26 = vld [vmem:[%s6398_s11 + $0x48] sm:$0xf]  ;;  %v4898_v27 = vcombine.low %v2463_v11, %v2466_v14  ;;  %v2471_v30 = vrot.slane %v2469_v52, 4  ;;  %v6128_v4 = vld [vmem:[%s6398_s11 + $0x30] sm:$0xff]  }
  0x64   : > { %5668 = vmatprep.mubr.msk.bf16.mxu0 %vm484_vm4, %v4894_v18  ;;  %v4867_v18 = vld [vmem:[%s6398_s11 + $0xc8] sm:$0x3]  ;;  %v4884_v34 = vrot.slane %v4866_v2, 10  ;;  %v1566_v35 = vrot.slane %v6843_v20, 2  ;;  %v4788_v38 = vld [vmem:[%s6398_s11 + $0xd0] sm:$0xf]  ;;  %v4602_v39 = vcombine.low %v213_v9, %v6528_v53  ;;  %v2470_v12 = vsel %vm6606_vm6, %v4883_v22, %v2469_v52 }
  0x65   : > { %v2479_v45 = vrot.slane %v4867_v18, 6  ;;  %v4603_v41 = vcombine.low %v215_v26, %v6553_v21  ;;  %v4868_v63 = vld [vmem:[%s6398_s11 + $0xcc] sm:$0xc]  ;;  %v4869_v29 = vld [vmem:[%s6398_s11 + $0xd4] sm:$0x3]  ;;  %v6131_v7 = vld [vmem:[%s6398_s11 + $0x3c] sm:$0xff]  }
  0x66   : > { %v2477_v23 = vsel %vm6606_vm6, %v4884_v34, %v2476_v17  ;;  %v217_v47 = vld [vmem:[%s6398_s11 + $0x54] sm:$0xf]  ;;  %v4885_v49 = vrot.slane %v4868_v63, 10  ;;  %v2486_v55 = vrot.slane %v4869_v29, 6  ;;  %v221_v19 = vld [vmem:[%s6398_s11 + $0x6c] sm:$0xf] }
  0x67   : > { %v4604_v58 = vcombine.low %v217_v47, %v6572_v42  ;;  %v4606_v24 = vcombine.low %v221_v19, %v6617_v36  ;;  %v225_v52 = vld [vmem:[%s6398_s11 + $0x84] sm:$0xf]  ;;  %v3456_v11 = vsel %vm533_vm0, %v3406_v48, 0  ;;  %v227_v14 = vld [vmem:[%s6398_s11 + $0x90] sm:$0xf]  ;;  %v6135_v48 = vld [vmem:[%s6398_s11 + $0x54] sm:$0xff]  }
  0x68   : > { %5517 = vmatmul.mubr.msk.bf16.vlgmr.msra.gmra.mrb[0].mxu1 %vm484_vm4, %v4598_v54  ;;  %v2478_v54 = vrot.slane %v2476_v17, 4  ;;  %v6900_v2 = vld [vmem:[%s7607_s1 + $0x10] sm:$0x3]  ;;  %v4608_v17 = vcombine.low %v225_v52, %v6660_v32  ;;  %v4609_v33 = vcombine.low %v227_v14, %v6680_v50  ;;  %v6137_v9 = vld [vmem:[%s6398_s11 + $0x60] sm:$0xff]   ;;  %v229_v18 = vld [vmem:[%s6398_s11 + $0x9c] sm:$0xf] }
  0x69   : > { %5549 = vmatpush3.bf16.msra.mxu1 %v1251_v44  ;;  %5520 = vmatprep.mubr.msk.bf16.mxu1 %vm484_vm4, %v4599_v56  ;;  %v2473_v56 = vsel %vm6606_vm6, %v2471_v30, %v2472_v25  ;;  %v2483_v44 = vrot.slane %v4788_v38, 6  ;;  %v231_v25 = vld [vmem:[%s6398_s11 + $0xa8] sm:$0xf]  ;;  %v974_v26 = vld [vmem:[%s6398_s11] sm:$0xc]  ;;  %v4610_v30 = vcombine.low %v229_v18, %v6696_v13  ;;  %v6145_v19 = vld [vmem:[%s6398_s11 + $0x90] sm:$0xff]  }
  0x6a   : > { %6047 = vmatprep.subr.msk.bf16.mxu1 %vm533_vm0, %v1566_v35  ;;  %v2480_v62 = vsel %vm6606_vm6, %v2478_v54, %v2479_v45  ;;  %v4899_v46 = vcombine.low %v2470_v12, %v2473_v56  ;;  %v4611_v34 = vcombine.low %v231_v25, %v6716_v40  ;;  %v4629_v54 = vrot.slane %v974_v26, 10  ;;  %v6170_v12 = vld [vmem:[%s6398_s11 + $0x10] sm:$0xf]  ;;  %v977_v47 = vld [vmem:[%s6398_s11 + $0x14] sm:$0x3] }
  0x6b   : > { %5669 = vmatmul.mubr.msk.bf16.gmra.mrb[16].mxu0 %vm484_vm4, %v4895_v43  ;;  %v4900_v43 = vcombine.low %v2477_v23, %v2480_v62  ;;  %v2485_v51 = vrot.slane %v2483_v44, 4  ;;  %v2484_v6 = vsel %vm6606_vm6, %v4885_v49, %v2483_v44  ;;  %v1050_v56 = vrot.slane %v6170_v12, 6  ;;  %v233_v44 = vld [vmem:[%s6398_s11 + $0xb4] sm:$0xf]  ;;  %v6171_v23 = vld [vmem:[%s6398_s11 + $0x1c] sm:$0xf] }
  0x6c   : > { %5672 = vmatprep.mubr.msk.bf16.mxu0 %vm484_vm4, %v4896_v57  ;;  %v219_v57 = vld [vmem:[%s6398_s11 + $0x60] sm:$0xf]  ;;  %v1057_v62 = vrot.slane %v6171_v23, 6  ;;  %v1616_v26 = vsel %vm533_vm0, %v1566_v35, 0  ;;  %v1078_v35 = vrot.slane %v6528_v53, 6 }
  0x6d   : > { %v2487_v59 = vsel %vm6606_vm6, %v2485_v51, %v2486_v55  ;;  %v4605_v60 = vcombine.low %v219_v57, %v6597_v15  ;;  %v979_v49 = vld [vmem:[%s6398_s11 + $0x20] sm:$0x3]  ;;  %v4612_v51 = vcombine.low %v233_v44, %v6729_v1  ;;  %v1052_v55 = vrot.slane %v1050_v56, 4  ;;  %v6173_v23 = vld [vmem:[%s7607_s1 + $0x8] sm:$0x3] }
  0x6e   : > { %v4901_v61 = vcombine.low %v2484_v6, %v2487_v59  ;;  %v1053_v6 = vrot.slane %v977_v47, 6  ;;  %v1085_v44 = vrot.slane %v6553_v21, 6 }
  0x70   : > { %5521 = vmatmul.mubr.msk.bf16.gmra.mrb[4].mxu1 %vm484_vm4, %v4600_v16  ;;  %v223_v16 = vld [vmem:[%s6398_s11 + $0x78] sm:$0xf] }
  0x71   : > { %5524 = vmatprep.mubr.msk.bf16.mxu1 %vm484_vm4, %v4601_v10  ;;  %v4607_v5 = vcombine.low %v223_v16, %v6637_v0  ;;  %v6133_v10 = vld [vmem:[%s6398_s11 + $0x48] sm:$0xff]  }
  0x73   : > { %5673 = vmatmul.mubr.msk.bf16.gmra.mrb[20].mxu0 %vm484_vm4, %v4897_v37  ;;  %v6169_v37 = vld [vmem:[%s6398_s11 + $0x4] sm:$0xf] }
  0x74   : > { %5676 = vmatprep.mubr.msk.bf16.mxu0 %vm484_vm4, %v4898_v27  ;;  %v1043_v22 = vrot.slane %v6169_v37, 6  ;;  %v975_v27 = vld [vmem:[%s6398_s11 + $0x8] sm:$0x3] }
  0x75   : > { %v1046_v38 = vrot.slane %v975_v27, 6 }
  0x76   : > { %v1045_v45 = vrot.slane %v1043_v22, 4  ;;  %v1044_v63 = vsel %vm6606_vm6, %v4629_v54, %v1043_v22  ;;  %v984_v54 = vld [vmem:[%s6398_s11 + $0x3c] sm:$0xc] }
  0x78   : > { %5525 = vmatmul.mubr.msk.bf16.gmra.mrb[8].mxu1 %vm484_vm4, %v4602_v39  ;;  %v6139_v39 = vld [vmem:[%s6398_s11 + $0x6c] sm:$0xff]   ;;  %v1047_v29 = vsel %vm6606_vm6, %v1045_v45, %v1046_v38 }
  0x79   : > { %5528 = vmatprep.mubr.msk.bf16.mxu1 %vm484_vm4, %v4603_v41  ;;  %v6141_v41 = vld [vmem:[%s6398_s11 + $0x78] sm:$0xff]   ;;  %v4645_v57 = vcombine.low %v1044_v63, %v1047_v29  ;;  %v6147_v45 = vld [vmem:[%s6398_s11 + $0xa8] sm:$0xff]   ;;  %v4634_v63 = vrot.slane %v984_v54, 10 }
  0x7b   : > { %5677 = vmatmul.mubr.msk.bf16.gmra.mrb[24].mxu0 %vm484_vm4, %v4899_v46  ;;  %v976_v46 = vld [vmem:[%s6398_s11 + $0xc] sm:$0xc] }
  0x7c   : > { %5680 = vmatprep.mubr.msk.bf16.mxu0 %vm484_vm4, %v4900_v43  ;;  %v978_v43 = vld [vmem:[%s6398_s11 + $0x18] sm:$0xc] }
  0x7d   : > { %v4631_v59 = vrot.slane %v978_v43, 10  ;;  %v1087_v43 = vrot.slane %v1085_v44, 4 }
  0x80   : > { %5529 = vmatmul.mubr.msk.bf16.gmra.mrb[12].mxu1 %vm484_vm4, %v4604_v58  ;;  %v4630_v58 = vrot.slane %v976_v46, 10  ;;  %v1080_v46 = vrot.slane %v1078_v35, 4 }
  0x81   : > { %5532 = vmatprep.mubr.msk.bf16.mxu1 %vm484_vm4, %v4605_v60  ;;  %v1059_v60 = vrot.slane %v1057_v62, 4 }
  0x82   : > { %v1051_v16 = vsel %vm6606_vm6, %v4630_v58, %v1050_v56  ;;  %v985_v56 = vld [vmem:[%s6398_s11 + $0x44] sm:$0x3] }
  0x83   : > { %5681 = vmatmul.mubr.msk.bf16.gmra.mrb[28].mxu0 %vm484_vm4, %v4901_v61  ;;  %v1060_v61 = vrot.slane %v979_v49, 6  ;;  %v1081_v47 = vrot.slane %v985_v56, 6  ;;  %v6149_v58 = vld [vmem:[%s6398_s11 + $0xc0] sm:$0xff]  }
  0x84   : > { %5686 = vmatprep.mubr.msk.bf16.mxu0 %vm484_vm4, %v6128_v4  ;;  %v6143_v4 = vld [vmem:[%s6398_s11 + $0x84] sm:$0xff]   ;;  %v995_v56 = vld [vmem:[%s6398_s11 + $0x80] sm:$0x3] }
  0x85   : > { %v1061_v14 = vsel %vm6606_vm6, %v1059_v60, %v1060_v61  ;;  %v989_v60 = vld [vmem:[%s6398_s11 + $0x5c] sm:$0x3]  ;;  %v1099_v61 = vrot.slane %v6597_v15, 6  ;;  %v4983_v15 = vld [vmem:[%s6398_s11 + $0x30] sm:$0xe] }
  0x88   : > { %5533 = vmatmul.mubr.msk.bf16.gmra.mrb[16].mxu1 %vm484_vm4, %v4606_v24  ;;  %v1054_v24 = vsel %vm6606_vm6, %v1052_v55, %v1053_v6  ;;  %v988_v55 = vld [vmem:[%s6398_s11 + $0x54] sm:$0xc]  ;;  %v1079_v6 = vsel %vm6606_vm6, %v4634_v63, %v1078_v35  ;;  %v4988_v63 = vld [vmem:[%s6398_s11 + $0x44] sm:$0x1] }
  0x89   : > { %5536 = vmatprep.mubr.msk.bf16.mxu1 %vm484_vm4, %v4607_v5  ;;  %v980_v5 = vld [vmem:[%s6398_s11 + $0x24] sm:$0xc] }
  0x8a   : > { %v4632_v37 = vrot.slane %v980_v5, 10 }
  0x8b   : > { %5687 = vmatmul.mubr.msk.bf16.vlgmr.msra.gmra.mrb[0].mxu0 %vm484_vm4, %v6131_v7  ;;  %v981_v7 = vld [vmem:[%s6398_s11 + $0x2c] sm:$0x3] }
  0x8c   : > { %5719 = vmatpush3.bf16.msra.mxu0 %v3456_v11  ;;  %5690 = vmatprep.mubr.msk.bf16.mxu0 %vm484_vm4, %v6133_v10  ;;  %v6172_v10 = vld [vmem:[%s6398_s11 + $0x28] sm:$0xf]  ;;  %v1058_v11 = vsel %vm6606_vm6, %v4631_v59, %v1057_v62  ;;  %v1067_v25 = vrot.slane %v981_v7, 6  ;;  %v987_v62 = vld [vmem:[%s6398_s11 + $0x50] sm:$0x3]  ;;  %v1082_v59 = vsel %vm6606_vm6, %v1080_v46, %v1081_v47  ;;  %v4636_v7 = vrot.slane %v988_v55, 10 }
  0x8d   : > { %6053 = vmatprep.subr.msk.bf16.mxu0 %vm533_vm0, %v6900_v2  ;;  %v1064_v52 = vrot.slane %v6172_v10, 6  ;;  %v4647_v18 = vcombine.low %v1058_v11, %v1061_v14  ;;  %v1088_v49 = vrot.slane %v987_v62, 6  ;;  %v4650_v5 = vcombine.low %v1079_v6, %v1082_v59  ;;  %v4985_v14 = vld [vmem:[%s6398_s11 + $0x38] sm:$0x1]  ;;  %v4989_v47 = vld [vmem:[%s6398_s11 + $0x48] sm:$0xe] }
  0x8e   : > { %v1095_v11 = vrot.slane %v989_v60, 6  ;;  %v3254_v59 = vrot.slane %v4988_v63, 5  ;;  %v6152_v60 = vld [vmem:[%s6398_s11 + $0xe4] sm:$0xff]  }
  0x8f   : > { %v1066_v22 = vrot.slane %v1064_v52, 4  ;;  %v1065_v38 = vsel %vm6606_vm6, %v4632_v37, %v1064_v52  ;;  %v992_v37 = vld [vmem:[%s6398_s11 + $0x6c] sm:$0xc] }
  0x90   : > { %5537 = vmatmul.mubr.msk.bf16.gmra.mrb[20].mxu1 %vm484_vm4, %v4608_v17  ;;  %v1071_v17 = vrot.slane %v6508_v31, 6 }
  0x91   : > { %5540 = vmatprep.mubr.msk.bf16.mxu1 %vm484_vm4, %v4609_v33  ;;  %v982_v33 = vld [vmem:[%s6398_s11 + $0x30] sm:$0xc]  ;;  %v1068_v20 = vsel %vm6606_vm6, %v1066_v22, %v1067_v25  ;;  %v7015_v22 = vld [vmem:[%s6398_s11 + $0x40] sm:$0xf]  ;;  %v6151_v25 = vld [vmem:[%s6398_s11 + $0xd8] sm:$0xff]  }
  0x92   : > { %v4633_v31 = vrot.slane %v982_v33, 10  ;;  %v1073_v27 = vrot.slane %v1071_v17, 4  ;;  %v4648_v53 = vcombine.low %v1065_v38, %v1068_v20  ;;  %v6150_v33 = vld [vmem:[%s6398_s11 + $0xcc] sm:$0xff]   ;;  %v4638_v38 = vrot.slane %v992_v37, 10  ;;  %v999_v37 = vld [vmem:[%s6398_s11 + $0x98] sm:$0x3] }
  0x93   : > { %5691 = vmatmul.mubr.msk.bf16.gmra.mrb[4].mxu0 %vm484_vm4, %v6135_v48  ;;  %v983_v48 = vld [vmem:[%s6398_s11 + $0x38] sm:$0x3] }
  0x94   : > { %5694 = vmatprep.mubr.msk.bf16.mxu0 %vm484_vm4, %v6137_v9  ;;  %v4646_v9 = vcombine.low %v1051_v16, %v1054_v24  ;;  %v990_v16 = vld [vmem:[%s6398_s11 + $0x60] sm:$0xc]  ;;  %v991_v24 = vld [vmem:[%s6398_s11 + $0x68] sm:$0x3] }
  0x98   : > { %5541 = vmatmul.mubr.msk.bf16.gmra.mrb[24].mxu1 %vm484_vm4, %v4610_v30  ;;  %v1074_v30 = vrot.slane %v983_v48, 6  ;;  %v4637_v48 = vrot.slane %v990_v16, 10  ;;  %v1120_v16 = vrot.slane %v6660_v32, 6 }
  0x99   : > { %5544 = vmatprep.mubr.msk.bf16.mxu1 %vm484_vm4, %v4611_v34  ;;  %v6146_v34 = vld [vmem:[%s6398_s11 + $0x9c] sm:$0xff]  }
  0x9a   : > { %v1075_v12 = vsel %vm6606_vm6, %v1073_v27, %v1074_v30  ;;  %v1106_v27 = vrot.slane %v6617_v36, 6  ;;  %v1100_v20 = vsel %vm6606_vm6, %v4637_v48, %v1099_v61  ;;  %v3251_v36 = vrot.slane %v7015_v22, 5 }
  0x9b   : > { %5695 = vmatmul.mubr.msk.bf16.gmra.mrb[8].mxu0 %vm484_vm4, %v6139_v39  ;;  %v1072_v39 = vsel %vm6606_vm6, %v4633_v31, %v1071_v17  ;;  %v3247_v31 = vrot.slane %v4985_v14, 5  ;;  %v1127_v14 = vrot.slane %v6680_v50, 6  ;;  %v4994_v50 = vld [vmem:[%s6398_s11 + $0x5c] sm:$0x1] }
  0x9c   : > { %5698 = vmatprep.mubr.msk.bf16.mxu0 %vm484_vm4, %v6141_v41  ;;  %v986_v41 = vld [vmem:[%s6398_s11 + $0x48] sm:$0xc]  ;;  %v4649_v29 = vcombine.low %v1072_v39, %v1075_v12  ;;  %v994_v39 = vld [vmem:[%s6398_s11 + $0x78] sm:$0xc]  ;;  %v1113_v12 = vrot.slane %v6637_v0, 6  ;;  %v3253_v6 = vrot.slane %v3251_v36, 4 }
  0x9d   : > { %v4635_v21 = vrot.slane %v986_v41, 10  ;;  %v7035_v41 = vld [vmem:[%s6398_s11 + $0x4c] sm:$0xf] }
  0x9e   : > { %v3258_v55 = vrot.slane %v7035_v41, 5  ;;  %v3255_v48 = vsel %vm6400_vm3, %v3253_v6, %v3254_v59 }
  0xa0   : > { %5545 = vmatmul.mubr.msk.bf16.gmra.mrb[28].mxu1 %vm484_vm4, %v4612_v51  ;;  %v6148_v51 = vld [vmem:[%s6398_s11 + $0xb4] sm:$0xff]  }
  0xa1   : > { %5550 = vmatprep.mubr.msk.bf16.mxu1 %vm484_vm4, %v4645_v57  ;;  %v1092_v57 = vrot.slane %v6572_v42, 6  ;;  %v1089_v42 = vsel %vm6606_vm6, %v1087_v43, %v1088_v49  ;;  %v4639_v43 = vrot.slane %v994_v39, 10  ;;  %v1115_v49 = vrot.slane %v1113_v12, 4  ;;  %v4997_v39 = vld [vmem:[%s6398_s11 + $0x68] sm:$0x1] }
  0xa3   : > { %5699 = vmatmul.mubr.msk.bf16.gmra.mrb[12].mxu0 %vm484_vm4, %v6143_v4  ;;  %v1086_v4 = vsel %vm6606_vm6, %v4635_v21, %v1085_v44  ;;  %v1094_v10 = vrot.slane %v1092_v57, 4  ;;  %v1093_v30 = vsel %vm6606_vm6, %v4636_v7, %v1092_v57  ;;  %v4991_v21 = vld [vmem:[%s6398_s11 + $0x50] sm:$0x1]  ;;  %v1107_v57 = vsel %vm6606_vm6, %v4638_v38, %v1106_v27  ;;  %v997_v7 = vld [vmem:[%s6398_s11 + $0x8c] sm:$0x3] }
  0xa4   : > { %5702 = vmatprep.mubr.msk.bf16.mxu0 %vm484_vm4, %v6145_v19  ;;  %v7003_v19 = vld [vmem:[%s6398_s11 + $0x34] sm:$0xf]  ;;  %v4651_v52 = vcombine.low %v1086_v4, %v1089_v42  ;;  %v5033_v4 = vrot.slane %v4989_v47, 9  ;;  %v3261_v42 = vrot.slane %v4991_v21, 5  ;;  %v3275_v47 = vrot.slane %v4997_v39, 5 }
  0xa5   : > { %v3244_v17 = vrot.slane %v7003_v19, 5  ;;  %v1134_v21 = vrot.slane %v6696_v13, 6  ;;  %v1002_v13 = vld [vmem:[%s6398_s11 + $0xa8] sm:$0xc] }
  0xa6   : > { %v7141_v39 = vld [vmem:[%s6398_s11 + $0x88] sm:$0xf] }
  0xa7   : > { %v3246_v54 = vrot.slane %v3244_v17, 4 }
  0xa8   : > { %5551 = vmatmul.mubr.msk.bf16.vlgmr.msra.gmra.mrb[0].mxu1 %vm484_vm4, %v4646_v9  ;;  %v1101_v9 = vrot.slane %v1099_v61, 4 }
  0xa9   : > { %5583 = vmatpush3.bf16.msra.mxu1 %v1616_v26  ;;  %5554 = vmatprep.mubr.msk.bf16.mxu1 %vm484_vm4, %v4647_v18  ;;  %v1102_v18 = vrot.slane %v991_v24, 6  ;;  %v5031_v26 = vrot.slane %v4983_v15, 9  ;;  %v3248_v0 = vsel %vm6400_vm3, %v3246_v54, %v3247_v31  ;;  %v1114_v15 = vsel %vm6606_vm6, %v4639_v43, %v1113_v12  ;;  %v4995_v54 = vld [vmem:[%s6398_s11 + $0x60] sm:$0xe]  ;;  %v7096_v43 = vld [vmem:[%s6398_s11 + $0x70] sm:$0xf] }
  0xaa   : > { %6049 = vmatprep.subr.msk.bf16.mxu1 %vm533_vm0, %v6173_v23  ;;  %v1108_v23 = vrot.slane %v1106_v27, 4  ;;  %v1123_v31 = vrot.slane %v997_v7, 6  ;;  %v5035_v63 = vrot.slane %v4995_v54, 9  ;;  %v1148_v54 = vrot.slane %v6729_v1, 6 }
  0xab   : > { %5703 = vmatmul.mubr.msk.bf16.gmra.mrb[16].mxu0 %vm484_vm4, %v6146_v34  ;;  %v1096_v34 = vsel %vm6606_vm6, %v1094_v10, %v1095_v11  ;;  %v1103_v35 = vsel %vm6606_vm6, %v1101_v9, %v1102_v18  ;;  %v3245_v46 = vsel %vm6400_vm3, %v5031_v26, %v3244_v17  ;;  %v7059_v10 = vld [vmem:[%s6398_s11 + $0x58] sm:$0xf]  ;;  %v3260_v11 = vrot.slane %v3258_v55, 4  ;;  %v7067_v17 = vld [vmem:[%s6398_s11 + $0x64] sm:$0xf] }
  0xac   : > { %5706 = vmatprep.mubr.msk.bf16.mxu0 %vm484_vm4, %v6147_v45  ;;  %v993_v45 = vld [vmem:[%s6398_s11 + $0x74] sm:$0x3]  ;;  %v4652_v44 = vcombine.low %v1093_v30, %v1096_v34  ;;  %v5047_v24 = vcombine.low %v3245_v46, %v3248_v0  ;;  %v998_v18 = vld [vmem:[%s6398_s11 + $0x90] sm:$0xc]  ;;  %v1122_v26 = vrot.slane %v1120_v16, 4  ;;  %v3265_v27 = vrot.slane %v7059_v10, 5 }
  0xad   : > { %v1109_v62 = vrot.slane %v993_v45, 6  ;;  %v4992_v9 = vld [vmem:[%s6398_s11 + $0x54] sm:$0xe]  ;;  %v3259_v34 = vsel %vm6400_vm3, %v5033_v4, %v3258_v55  ;;  %v3272_v45 = vrot.slane %v7067_v17, 5  ;;  %v3262_v38 = vsel %vm6400_vm3, %v3260_v11, %v3261_v42 }
  0xae   : > { %v5049_v46 = vcombine.low %v3259_v34, %v3262_v38  ;;  %v3279_v42 = vrot.slane %v7096_v43, 5  ;;  %v4643_v11 = vrot.slane %v1002_v13, 10  ;;  %v1004_v34 = vld [vmem:[%s6398_s11 + $0xb4] sm:$0xc] }
  0xaf   : > { %v1110_v61 = vsel %vm6606_vm6, %v1108_v23, %v1109_v62  ;;  %v1124_v62 = vsel %vm6606_vm6, %v1122_v26, %v1123_v31  ;;  %v3274_v0 = vrot.slane %v3272_v45, 4  ;;  %v3273_v4 = vsel %vm6400_vm3, %v5035_v63, %v3272_v45 }
  0xb0   : > { %5555 = vmatmul.mubr.msk.bf16.gmra.mrb[4].mxu1 %vm484_vm4, %v4648_v53  ;;  %v4986_v53 = vld [vmem:[%s6398_s11 + $0x3c] sm:$0xe]  ;;  %v4654_v32 = vcombine.low %v1107_v57, %v1110_v61  ;;  %v1001_v57 = vld [vmem:[%s6398_s11 + $0xa4] sm:$0x3]  ;;  %v3281_v26 = vrot.slane %v3279_v42, 4  ;;  %v1150_v63 = vrot.slane %v1148_v54, 4 }
  0xb1   : > { %5558 = vmatprep.mubr.msk.bf16.mxu1 %vm484_vm4, %v4649_v29  ;;  %v4653_v29 = vcombine.low %v1100_v20, %v1103_v35  ;;  %v4641_v20 = vrot.slane %v998_v18, 10  ;;  %v1129_v35 = vrot.slane %v1127_v14, 4  ;;  %v7111_v61 = vld [vmem:[%s6398_s11 + $0x7c] sm:$0xf]  ;;  %v1137_v7 = vrot.slane %v1001_v57, 6 }
  0xb2   : > { %v5003_v18 = vld [vmem:[%s6398_s11 + $0x80] sm:$0x1] }
  0xb3   : > { %5707 = vmatmul.mubr.msk.bf16.gmra.mrb[20].mxu0 %vm484_vm4, %v6148_v51  ;;  %v1116_v51 = vrot.slane %v995_v56, 6  ;;  %v5034_v56 = vrot.slane %v4992_v9, 9 }
  0xb4   : > { %5710 = vmatprep.mubr.msk.bf16.mxu0 %vm484_vm4, %v6149_v58  ;;  %v5032_v58 = vrot.slane %v4986_v53, 9  ;;  %v3267_v53 = vrot.slane %v3265_v27, 4 }
  0xb5   : > { %v3266_v59 = vsel %vm6400_vm3, %v5034_v56, %v3265_v27 }
  0xb8   : > { %5559 = vmatmul.mubr.msk.bf16.gmra.mrb[8].mxu1 %vm484_vm4, %v4650_v5  ;;  %v996_v5 = vld [vmem:[%s6398_s11 + $0x84] sm:$0xc] }
  0xb9   : > { %5562 = vmatprep.mubr.msk.bf16.mxu1 %vm484_vm4, %v4651_v52  ;;  %v1117_v52 = vsel %vm6606_vm6, %v1115_v49, %v1116_v51  ;;  %v3925_v49 = vsel %vm533_vm0, %v6900_v2, 0  ;;  %v1128_v51 = vsel %vm6606_vm6, %v4641_v20, %v1127_v14 }
  0xba   : > { %v4655_v30 = vcombine.low %v1114_v15, %v1117_v52  ;;  %v4998_v15 = vld [vmem:[%s6398_s11 + $0x6c] sm:$0xe]  ;;  %v5000_v52 = vld [vmem:[%s6398_s11 + $0x74] sm:$0x1] }
  0xbb   : > { %5711 = vmatmul.mubr.msk.bf16.gmra.mrb[24].mxu0 %vm484_vm4, %v6150_v33  ;;  %v3252_v33 = vsel %vm6400_vm3, %v5032_v58, %v3251_v36  ;;  %v1130_v36 = vrot.slane %v999_v37, 6  ;;  %v1141_v58 = vrot.slane %v6716_v40, 6  ;;  %v3282_v31 = vrot.slane %v5000_v52, 5  ;;  %v6153_v52 = vld [vmem:[%s6398_s11 + $0x18] sm:$0xff]  }
  0xbc   : > { %5714 = vmatprep.mubr.msk.bf16.mxu0 %vm484_vm4, %v6151_v25  ;;  %v4640_v25 = vrot.slane %v996_v5, 10  ;;  %v5048_v12 = vcombine.low %v3252_v33, %v3255_v48  ;;  %v1136_v5 = vrot.slane %v1134_v21, 4  ;;  %v5001_v33 = vld [vmem:[%s6398_s11 + $0x78] sm:$0xe]  ;;  %v3286_v48 = vrot.slane %v7111_v61, 5 }
  0xbd   : > { %v1131_v55 = vsel %vm6606_vm6, %v1129_v35, %v1130_v36  ;;  %v1143_v14 = vrot.slane %v1141_v58, 4  ;;  %v1142_v45 = vsel %vm6606_vm6, %v4643_v11, %v1141_v58  ;;  %v3289_v35 = vrot.slane %v5003_v18, 5  ;;  %v1005_v36 = vld [vmem:[%s6398_s11 + $0xbc] sm:$0x3]  ;;  %v5013_v18 = vld [vmem:[%s6398_s11 + $0xa8] sm:$0xe] }
  0xbe   : > { %v1121_v23 = vsel %vm6606_vm6, %v4640_v25, %v1120_v16  ;;  %v4657_v16 = vcombine.low %v1128_v51, %v1131_v55  ;;  %v5036_v25 = vrot.slane %v4998_v15, 9  ;;  %v1138_v27 = vsel %vm6606_vm6, %v1136_v5, %v1137_v7  ;;  %v5007_v51 = vld [vmem:[%s6398_s11 + $0x90] sm:$0xe]  ;;  %v5009_v55 = vld [vmem:[%s6398_s11 + $0x98] sm:$0x1] }
  0xbf   : > { %v4656_v6 = vcombine.low %v1121_v23, %v1124_v62  ;;  %v3288_v20 = vrot.slane %v3286_v48, 4  ;;  %v4644_v23 = vrot.slane %v1004_v34, 10  ;;  %v5004_v62 = vld [vmem:[%s6398_s11 + $0x84] sm:$0xe] }
  0xc0   : > { %5563 = vmatmul.mubr.msk.bf16.gmra.mrb[12].mxu1 %vm484_vm4, %v4652_v44  ;;  %v3268_v44 = vrot.slane %v4994_v50, 5  ;;  %v3280_v1 = vsel %vm6400_vm3, %v5036_v25, %v3279_v42  ;;  %v5038_v58 = vrot.slane %v5004_v62, 9  ;;  %v3303_v42 = vrot.slane %v5009_v55, 5  ;;  %v5016_v62 = vld [vmem:[%s6398_s11 + $0xb4] sm:$0xe] }
  0xc1   : > { %5566 = vmatprep.mubr.msk.bf16.mxu1 %vm484_vm4, %v4653_v29  ;;  %v1000_v29 = vld [vmem:[%s6398_s11 + $0x9c] sm:$0xc]  ;;  %v1149_v13 = vsel %vm6606_vm6, %v4644_v23, %v1148_v54 }
  0xc2   : > { %v3269_v2 = vsel %vm6400_vm3, %v3267_v53, %v3268_v44  ;;  %v4642_v40 = vrot.slane %v1000_v29, 10  ;;  %v3283_v44 = vsel %vm6400_vm3, %v3281_v26, %v3282_v31  ;;  %v1151_v29 = vrot.slane %v1005_v36, 6 }
  0xc3   : > { %5715 = vmatmul.mubr.msk.bf16.gmra.mrb[28].mxu0 %vm484_vm4, %v6152_v60  ;;  %v1003_v60 = vld [vmem:[%s6398_s11 + $0xb0] sm:$0x3]  ;;  %v5050_v9 = vcombine.low %v3266_v59, %v3269_v2  ;;  %v5052_v57 = vcombine.low %v3280_v1, %v3283_v44 }
  0xc4   : > { %5720 = vmatprep.mubr.msk.bf16.mxu0 %vm484_vm4, %v5047_v24  ;;  %v3276_v24 = vsel %vm6400_vm3, %v3274_v0, %v3275_v47  ;;  %v1135_v37 = vsel %vm6606_vm6, %v4642_v40, %v1134_v21  ;;  %v3293_v0 = vrot.slane %v7141_v39, 5  ;;  %v3290_v21 = vsel %vm6400_vm3, %v3288_v20, %v3289_v35  ;;  %v6154_v20 = vld [vmem:[%s6398_s11 + $0x24] sm:$0xff]  }
  0xc5   : > { %v5051_v50 = vcombine.low %v3273_v4, %v3276_v24  ;;  %v4658_v56 = vcombine.low %v1135_v37, %v1138_v27  ;;  %v5039_v4 = vrot.slane %v5007_v51, 9  ;;  %v7172_v24 = vld [vmem:[%s6398_s11 + $0xac] sm:$0xf]  ;;  %v5015_v37 = vld [vmem:[%s6398_s11 + $0xb0] sm:$0x1] }
  0xc6   : > { %v3295_v2 = vrot.slane %v3293_v0, 4  ;;  %v3294_v7 = vsel %vm6400_vm3, %v5038_v58, %v3293_v0  ;;  %v3317_v54 = vrot.slane %v5015_v37, 5 }
  0xc8   : > { %5567 = vmatmul.mubr.msk.bf16.gmra.mrb[16].mxu1 %vm484_vm4, %v4654_v32  ;;  %v1144_v32 = vrot.slane %v1003_v60, 6  ;;  %v1152_v60 = vsel %vm6606_vm6, %v1150_v63, %v1151_v29  ;;  %v5019_v29 = vld [vmem:[%s6398_s11 + $0xc0] sm:$0xe] }
  0xc9   : > { %5570 = vmatprep.mubr.msk.bf16.mxu1 %vm484_vm4, %v4655_v30  ;;  %v5037_v30 = vrot.slane %v5001_v33, 9  ;;  %v4660_v5 = vcombine.low %v1149_v13, %v1152_v60  ;;  %v5010_v33 = vld [vmem:[%s6398_s11 + $0x9c] sm:$0xe]  ;;  %v5043_v55 = vrot.slane %v5019_v29, 9 }
  0xca   : > { %v1145_v38 = vsel %vm6606_vm6, %v1143_v14, %v1144_v32  ;;  %v5040_v31 = vrot.slane %v5010_v33, 9 }
  0xcb   : > { %5721 = vmatmul.mubr.msk.bf16.vlgmr.msra.gmra.mrb[0].mxu0 %vm484_vm4, %v5048_v12  ;;  %v7144_v12 = vld [vmem:[%s6398_s11 + $0x94] sm:$0xf]  ;;  %v4659_v53 = vcombine.low %v1142_v45, %v1145_v38  ;;  %v3287_v47 = vsel %vm6400_vm3, %v5037_v30, %v3286_v48  ;;  %v5012_v48 = vld [vmem:[%s6398_s11 + $0xa4] sm:$0x1]  ;;  %v5041_v30 = vrot.slane %v5013_v18, 9 }
  0xcc   : > { %5753 = vmatpush3.bf16.msra.mxu0 %v3925_v49  ;;  %5724 = vmatprep.mubr.msk.bf16.mxu0 %vm484_vm4, %v5049_v46  ;;  %v5006_v46 = vld [vmem:[%s6398_s11 + $0x8c] sm:$0x1]  ;;  %v3300_v49 = vrot.slane %v7144_v12, 5  ;;  %v5053_v59 = vcombine.low %v3287_v47, %v3290_v21  ;;  %v3310_v27 = vrot.slane %v5012_v48, 5  ;;  %v7194_v45 = vld [vmem:[%s6398_s11 + $0xb8] sm:$0xf] }
  0xcd   : > { %v7197_v38 = vld [vmem:[%s6398_s11 + $0xc4] sm:$0xf]  ;;  %v3321_v1 = vrot.slane %v7194_v45, 5  ;;  %v5042_v21 = vrot.slane %v5016_v62, 9 }
  0xce   : > { %v3302_v40 = vrot.slane %v3300_v49, 4  ;;  %v3301_v14 = vsel %vm6400_vm3, %v5039_v4, %v3300_v49  ;;  %v3328_v63 = vrot.slane %v7197_v38, 5 }
  0xcf   : > { %v3323_v49 = vrot.slane %v3321_v1, 4  ;;  %v3322_v13 = vsel %vm6400_vm3, %v5042_v21, %v3321_v1  ;;  %v5080_v1 = vld [vmem:[%s6398_s11 + $0x30] sm:$0xc] }
  0xd0   : > { %5571 = vmatmul.mubr.msk.bf16.gmra.mrb[20].mxu1 %vm484_vm4, %v4656_v6  ;;  %v3296_v6 = vrot.slane %v5006_v46, 5  ;;  %v3304_v32 = vsel %vm6400_vm3, %v3302_v40, %v3303_v42  ;;  %v5021_v46 = vld [vmem:[%s6398_s11 + $0xc8] sm:$0x1]  ;;  %v3329_v40 = vsel %vm6400_vm3, %v5043_v55, %v3328_v63  ;;  %v3724_v55 = vrot.slane %v7015_v22, 6 }
  0xd1   : > { %5574 = vmatprep.mubr.msk.bf16.mxu1 %vm484_vm4, %v4657_v16  ;;  %v7169_v16 = vld [vmem:[%s6398_s11 + $0xa0] sm:$0xf]  ;;  %v5055_v26 = vcombine.low %v3301_v14, %v3304_v32  ;;  %v3331_v58 = vrot.slane %v5021_v46, 5  ;;  %v5112_v46 = vrot.slane %v5080_v1, 10 }
  0xd2   : > { %v3297_v15 = vsel %vm6400_vm3, %v3295_v2, %v3296_v6  ;;  %v3307_v11 = vrot.slane %v7169_v16, 5  ;;  %v7221_v6 = vld [vmem:[%s6398_s11 + $0xd0] sm:$0xf]  ;;  %v6157_v2 = vld [vmem:[%s6398_s11 + $0x48] sm:$0xff]  }
  0xd3   : > { %5725 = vmatmul.mubr.msk.bf16.gmra.mrb[4].mxu0 %vm484_vm4, %v5050_v9  ;;  %v3314_v9 = vrot.slane %v7172_v24, 5  ;;  %v5054_v25 = vcombine.low %v3294_v7, %v3297_v15  ;;  %v3335_v4 = vrot.slane %v7221_v6, 5  ;;  %v5024_v7 = vld [vmem:[%s6398_s11 + $0xd4] sm:$0x1] }
  0xd4   : > { %5728 = vmatprep.mubr.msk.bf16.mxu0 %vm484_vm4, %v5051_v50  ;;  %v3309_v50 = vrot.slane %v3307_v11, 4  ;;  %v3308_v35 = vsel %vm6400_vm3, %v5040_v31, %v3307_v11  ;;  %v5027_v11 = vld [vmem:[%s6398_s11 + $0xe0] sm:$0x1]  ;;  %v6158_v31 = vld [vmem:[%s6398_s11 + $0x54] sm:$0xff]  }
  0xd5   : > { %v3316_v34 = vrot.slane %v3314_v9, 4  ;;  %v3315_v44 = vsel %vm6400_vm3, %v5041_v30, %v3314_v9  ;;  %v3337_v48 = vrot.slane %v3335_v4, 4  ;;  %v3338_v9 = vrot.slane %v5024_v7, 5  ;;  %v6159_v30 = vld [vmem:[%s6398_s11 + $0x60] sm:$0xff]  }
  0xd6   : > { %v3311_v36 = vsel %vm6400_vm3, %v3309_v50, %v3310_v27 }
  0xd7   : > { %v3318_v23 = vsel %vm6400_vm3, %v3316_v34, %v3317_v54  ;;  %v5056_v0 = vcombine.low %v3308_v35, %v3311_v36  ;;  %v3339_v27 = vsel %vm6400_vm3, %v3337_v48, %v3338_v9  ;;  %v5028_v35 = vld [vmem:[%s6398_s11 + $0xe4] sm:$0xe]  ;;  %v5030_v36 = vld [vmem:[%s6398_s11 + $0xec] sm:$0x1]  ;;  %v3738_v48 = vrot.slane %v7059_v10, 6 }
  0xd8   : > { %5575 = vmatmul.mubr.msk.bf16.gmra.mrb[24].mxu1 %vm484_vm4, %v4658_v56  ;;  %v6155_v56 = vld [vmem:[%s6398_s11 + $0x30] sm:$0xff]   ;;  %v5057_v47 = vcombine.low %v3315_v44, %v3318_v23  ;;  %v5081_v44 = vld [vmem:[%s6398_s11 + $0x38] sm:$0x3]  ;;  %v3352_v29 = vrot.slane %v5030_v36, 5 }
  0xd9   : > { %5578 = vmatprep.mubr.msk.bf16.mxu1 %vm484_vm4, %v4659_v53  ;;  %v5018_v53 = vld [vmem:[%s6398_s11 + $0xbc] sm:$0x1] }
  0xda   : > { %v3324_v51 = vrot.slane %v5018_v53, 5  ;;  %v5046_v53 = vrot.slane %v5028_v35, 9 }
  0xdb   : > { %5729 = vmatmul.mubr.msk.bf16.gmra.mrb[8].mxu0 %vm484_vm4, %v5052_v57  ;;  %v3330_v57 = vrot.slane %v3328_v63, 4 }
  0xdc   : > { %5732 = vmatprep.mubr.msk.bf16.mxu0 %vm484_vm4, %v5053_v59  ;;  %v7224_v59 = vld [vmem:[%s6398_s11 + $0xdc] sm:$0xf]  ;;  %v3325_v60 = vsel %vm6400_vm3, %v3323_v49, %v3324_v51 }
  0xdd   : > { %v3332_v42 = vsel %vm6400_vm3, %v3330_v57, %v3331_v58  ;;  %v3342_v15 = vrot.slane %v7224_v59, 5  ;;  %v5058_v14 = vcombine.low %v3322_v13, %v3325_v60  ;;  %v6161_v51 = vld [vmem:[%s6398_s11 + $0x78] sm:$0xff]   ;;  %v5083_v13 = vld [vmem:[%s6398_s11 + $0x44] sm:$0x3]  ;;  %v3731_v60 = vrot.slane %v7035_v41, 6 }
  0xde   : > { %v5059_v32 = vcombine.low %v3329_v40, %v3332_v42  ;;  %v3727_v7 = vrot.slane %v5083_v13, 6  ;;  %v6162_v41 = vld [vmem:[%s6398_s11 + $0x84] sm:$0xff]   ;;  %v6174_v13 = vld [vmem:[%s6398_s11 + $0x7c] sm:$0xf] }
  0xdf   : > { %v3344_v37 = vrot.slane %v3342_v15, 4 }
  0xe0   : > { %5579 = vmatmul.mubr.msk.bf16.gmra.mrb[28].mxu1 %vm484_vm4, %v4660_v5  ;;  %v5022_v5 = vld [vmem:[%s6398_s11 + $0xcc] sm:$0xe] }
  0xe1   : > { %5584 = vmatprep.mubr.msk.bf16.mxu1 %vm484_vm4, %v6153_v52  ;;  %v5025_v52 = vld [vmem:[%s6398_s11 + $0xd8] sm:$0xe]  ;;  %v5044_v33 = vrot.slane %v5022_v5, 9  ;;  %v3726_v5 = vrot.slane %v3724_v55, 4 }
  0xe2   : > { %v5045_v18 = vrot.slane %v5025_v52, 9  ;;  %v3733_v52 = vrot.slane %v3731_v60, 4 }
  0xe3   : > { %5733 = vmatmul.mubr.msk.bf16.gmra.mrb[12].mxu0 %vm484_vm4, %v5054_v25  ;;  %v3345_v25 = vrot.slane %v5027_v11, 5  ;;  %v3336_v50 = vsel %vm6400_vm3, %v5044_v33, %v3335_v4  ;;  %v5085_v4 = vld [vmem:[%s6398_s11 + $0x50] sm:$0x3] }
  0xe4   : > { %5736 = vmatprep.mubr.msk.bf16.mxu0 %vm484_vm4, %v5055_v26  ;;  %v7247_v26 = vld [vmem:[%s6398_s11 + $0xe8] sm:$0xf]  ;;  %v3343_v54 = vsel %vm6400_vm3, %v5045_v18, %v3342_v15  ;;  %v5060_v23 = vcombine.low %v3336_v50, %v3339_v27  ;;  %v3734_v11 = vrot.slane %v5085_v4, 6  ;;  %v6163_v33 = vld [vmem:[%s6398_s11 + $0x90] sm:$0xff]   ;;  %v5088_v50 = vld [vmem:[%s6398_s11 + $0x60] sm:$0xc] }
  0xe5   : > { %v3349_v34 = vrot.slane %v7247_v26, 5  ;;  %v5089_v27 = vld [vmem:[%s6398_s11 + $0x68] sm:$0x3]  ;;  %v5116_v35 = vrot.slane %v5088_v50, 10  ;;  %v6166_v4 = vld [vmem:[%s6398_s11 + $0xb4] sm:$0xff]  }
  0xe6   : > { %v3735_v18 = vsel %vm6606_vm6, %v3733_v52, %v3734_v11  ;;  %v3773_v11 = vrot.slane %v7144_v12, 6  ;;  %v4769_v50 = vld [vmem:[%s6398_s11 + $0x84] sm:$0xe] }
  0xe7   : > { %v3351_v63 = vrot.slane %v3349_v34, 4  ;;  %v3350_v21 = vsel %vm6400_vm3, %v5046_v53, %v3349_v34 }
  0xe8   : > { %5585 = vmatmul.mubr.msk.bf16.vlgmr.msra.gmra.mrb[0].mxu1 %vm484_vm4, %v6154_v20  ;;  %v3346_v20 = vsel %vm6400_vm3, %v3344_v37, %v3345_v25  ;;  %v5086_v37 = vld [vmem:[%s6398_s11 + $0x54] sm:$0xc]  ;;  %v5087_v25 = vld [vmem:[%s6398_s11 + $0x5c] sm:$0x3] }
  0xe9   : > { %5787 = vmatpush3.bf16.msra.mxu1 %v6382_v3  ;;  %5588 = vmatprep.mubr.msk.bf16.mxu1 %vm484_vm4, %v6155_v56  ;;  %v6156_v3 = vld [vmem:[%s6398_s11 + $0x3c] sm:$0xff]   ;;  %v3717_v56 = vrot.slane %v7003_v19, 6  ;;  %v5061_v62 = vcombine.low %v3343_v54, %v3346_v20  ;;  %v6160_v19 = vld [vmem:[%s6398_s11 + $0x6c] sm:$0xff]   ;;  %v3353_v49 = vsel %vm6400_vm3, %v3351_v63, %v3352_v29  ;;  %v5115_v34 = vrot.slane %v5086_v37, 10 }
  0xea   : > { %v5062_v40 = vcombine.low %v3350_v21, %v3353_v49  ;;  %v3740_v54 = vrot.slane %v3738_v48, 4  ;;  %v3741_v20 = vrot.slane %v5087_v25, 6  ;;  %v5090_v29 = vld [vmem:[%s6398_s11 + $0x6c] sm:$0xc] }
  0xeb   : > { %5737 = vmatmul.mubr.msk.bf16.gmra.mrb[16].mxu0 %vm484_vm4, %v5056_v0  ;;  %v3719_v0 = vrot.slane %v3717_v56, 4  ;;  %v3718_v57 = vsel %vm6606_vm6, %v5112_v46, %v3717_v56  ;;  %v3748_v56 = vrot.slane %v5089_v27, 6  ;;  %v3739_v1 = vsel %vm6606_vm6, %v5115_v34, %v3738_v48  ;;  %v5091_v46 = vld [vmem:[%s6398_s11 + $0x74] sm:$0x3]  ;;  %v5097_v48 = vld [vmem:[%s6398_s11 + $0x98] sm:$0x3] }
  0xec   : > { %5740 = vmatprep.mubr.msk.bf16.mxu0 %vm484_vm4, %v5057_v47  ;;  %v3720_v47 = vrot.slane %v5081_v44, 6  ;;  %v3742_v44 = vsel %vm6606_vm6, %v3740_v54, %v3741_v20  ;;  %v5117_v49 = vrot.slane %v5090_v29, 10  ;;  %v3776_v34 = vrot.slane %v5097_v48, 6  ;;  %v4771_v54 = vld [vmem:[%s6398_s11 + $0x8c] sm:$0x1] }
  0xed   : > { %v1975_v29 = vrot.slane %v4771_v54, 5  ;;  %v3801_v54 = vrot.slane %v7197_v38, 6 }
  0xee   : > { %v3721_v58 = vsel %vm6606_vm6, %v3719_v0, %v3720_v47  ;;  %v3759_v0 = vrot.slane %v7111_v61, 6  ;;  %v5092_v47 = vld [vmem:[%s6398_s11 + $0x78] sm:$0xc] }
  0xef   : > { %v5128_v22 = vcombine.low %v3718_v57, %v3721_v58  ;;  %v5118_v57 = vrot.slane %v5092_v47, 10  ;;  %v4766_v61 = vld [vmem:[%s6398_s11 + $0x78] sm:$0xe] }
  0xf0   : > { %5589 = vmatmul.mubr.msk.bf16.gmra.mrb[4].mxu1 %vm484_vm4, %v6156_v3  ;;  %v5082_v3 = vld [vmem:[%s6398_s11 + $0x3c] sm:$0xc]  ;;  %v3761_v58 = vrot.slane %v3759_v0, 4  ;;  %v4798_v52 = vrot.slane %v4766_v61, 9 }
  0xf1   : > { %5592 = vmatprep.mubr.msk.bf16.mxu1 %vm484_vm4, %v6157_v2  ;;  %v5084_v2 = vld [vmem:[%s6398_s11 + $0x48] sm:$0xc]  ;;  %v5113_v42 = vrot.slane %v5082_v3, 10 }
  0xf2   : > { %v5114_v15 = vrot.slane %v5084_v2, 10  ;;  %v4768_v2 = vld [vmem:[%s6398_s11 + $0x80] sm:$0x1] }
  0xf3   : > { %5741 = vmatmul.mubr.msk.bf16.gmra.mrb[20].mxu0 %vm484_vm4, %v5058_v14  ;;  %v3725_v14 = vsel %vm6606_vm6, %v5113_v42, %v3724_v55  ;;  %v3755_v55 = vrot.slane %v5091_v46, 6  ;;  %v5098_v46 = vld [vmem:[%s6398_s11 + $0x9c] sm:$0xc] }
  0xf4   : > { %5744 = vmatprep.mubr.msk.bf16.mxu0 %vm484_vm4, %v5059_v32  ;;  %v3728_v32 = vsel %vm6606_vm6, %v3726_v5, %v3727_v7  ;;  %v3732_v9 = vsel %vm6606_vm6, %v5114_v15, %v3731_v60  ;;  %v1965_v60 = vrot.slane %v6174_v13, 5  ;;  %v5094_v7 = vld [vmem:[%s6398_s11 + $0x84] sm:$0xc]  ;;  %v5095_v15 = vld [vmem:[%s6398_s11 + $0x8c] sm:$0x3]  ;;  %v5121_v13 = vrot.slane %v5098_v46, 10 }
  0xf5   : > { %v5130_v10 = vcombine.low %v3732_v9, %v3735_v18  ;;  %v6175_v9 = vld [vmem:[%s6398_s11 + $0x88] sm:$0xf]  ;;  %v5119_v25 = vrot.slane %v5094_v7, 10 }
  0xf6   : > { %v1972_v18 = vrot.slane %v6175_v9, 5  ;;  %v1966_v20 = vsel %vm6400_vm3, %v4798_v52, %v1965_v60  ;;  %v4778_v9 = vld [vmem:[%s6398_s11 + $0xa8] sm:$0xe] }
  0xf8   : > { %5593 = vmatmul.mubr.msk.bf16.gmra.mrb[8].mxu1 %vm484_vm4, %v6158_v31  ;;  %v3745_v31 = vrot.slane %v7067_v17, 6  ;;  %v6164_v17 = vld [vmem:[%s6398_s11 + $0x9c] sm:$0xff]  }
  0xf9   : > { %5596 = vmatprep.mubr.msk.bf16.mxu1 %vm484_vm4, %v6159_v30  ;;  %v5129_v30 = vcombine.low %v3725_v14, %v3728_v32  ;;  %v1967_v14 = vrot.slane %v1965_v60, 4  ;;  %v1968_v32 = vrot.slane %v4768_v2, 5 }
  0xfa   : > { %v3747_v36 = vrot.slane %v3745_v31, 4  ;;  %v3746_v53 = vsel %vm6606_vm6, %v5116_v35, %v3745_v31  ;;  %v3769_v31 = vrot.slane %v5095_v15, 6  ;;  %v4777_v15 = vld [vmem:[%s6398_s11 + $0xa4] sm:$0x1] }
  0xfb   : > { %5745 = vmatmul.mubr.msk.bf16.gmra.mrb[24].mxu0 %vm484_vm4, %v5060_v23  ;;  %v6165_v23 = vld [vmem:[%s6398_s11 + $0xa8] sm:$0xff]   ;;  %v1969_v35 = vsel %vm6400_vm3, %v1967_v14, %v1968_v32 }
  0xfc   : > { %5748 = vmatprep.mubr.msk.bf16.mxu0 %vm484_vm4, %v5061_v62  ;;  %v3752_v62 = vrot.slane %v7096_v43, 6  ;;  %v3749_v63 = vsel %vm6606_vm6, %v3747_v36, %v3748_v56  ;;  %v5131_v43 = vcombine.low %v3739_v1, %v3742_v44  ;;  %v6176_v36 = vld [vmem:[%s6398_s11 + $0x94] sm:$0xf]  ;;  %v4799_v1 = vrot.slane %v4769_v50, 9  ;;  %v4772_v44 = vld [vmem:[%s6398_s11 + $0x90] sm:$0xe] }
  0xfd   : > { %v5132_v21 = vcombine.low %v3746_v53, %v3749_v63  ;;  %v1979_v56 = vrot.slane %v6176_v36, 5  ;;  %v4814_v47 = vcombine.low %v1966_v20, %v1969_v35  ;;  %v3794_v50 = vrot.slane %v7194_v45, 6 }
  0xfe   : > { %v3753_v42 = vsel %vm6606_vm6, %v5117_v49, %v3752_v62  ;;  %v5100_v49 = vld [vmem:[%s6398_s11 + $0xa8] sm:$0xc]  ;;  %v1973_v61 = vsel %vm6400_vm3, %v4799_v1, %v1972_v18  ;;  %v4802_v35 = vrot.slane %v4778_v9, 9 }
 0x100   : > { %5597 = vmatmul.mubr.msk.bf16.gmra.mrb[12].mxu1 %vm484_vm4, %v6160_v19  ;;  %v5093_v19 = vld [vmem:[%s6398_s11 + $0x80] sm:$0x3] }
 0x101   : > { %5600 = vmatprep.mubr.msk.bf16.mxu1 %vm484_vm4, %v6161_v51  ;;  %v3754_v51 = vrot.slane %v3752_v62, 4  ;;  %v3762_v3 = vrot.slane %v5093_v19, 6  ;;  %v6168_v62 = vld [vmem:[%s6398_s11 + $0xcc] sm:$0xff]  }
 0x103   : > { %5749 = vmatmul.mubr.msk.bf16.gmra.mrb[28].mxu0 %vm484_vm4, %v5062_v40  ;;  %v6167_v40 = vld [vmem:[%s6398_s11 + $0xc0] sm:$0xff]   ;;  %v3756_v5 = vsel %vm6606_vm6, %v3754_v51, %v3755_v55  ;;  %v4800_v51 = vrot.slane %v4772_v44, 9  ;;  %v1981_v55 = vrot.slane %v1979_v56, 4 }
 0x104   : > { %5754 = vmatprep.mubr.msk.bf16.mxu0 %vm484_vm4, %v5128_v22  ;;  %v3766_v22 = vrot.slane %v7141_v39, 6  ;;  %v3763_v39 = vsel %vm6606_vm6, %v3761_v58, %v3762_v3  ;;  %v5133_v37 = vcombine.low %v3753_v42, %v3756_v5  ;;  %v5101_v58 = vld [vmem:[%s6398_s11 + $0xb0] sm:$0x3]  ;;  %v5122_v5 = vrot.slane %v5100_v49, 10  ;;  %v4783_v49 = vld [vmem:[%s6398_s11 + $0xbc] sm:$0x1] }
 0x105   : > { %v3790_v7 = vrot.slane %v5101_v58, 6  ;;  %v1980_v52 = vsel %vm6400_vm3, %v4800_v51, %v1979_v56  ;;  %v6180_v51 = vld [vmem:[%s6398_s11 + $0xc4] sm:$0xf] }
 0x106   : > { %v3768_v12 = vrot.slane %v3766_v22, 4  ;;  %v3767_v53 = vsel %vm6606_vm6, %v5119_v25, %v3766_v22  ;;  %v6177_v22 = vld [vmem:[%s6398_s11 + $0xa0] sm:$0xf] }
 0x107   : > { %v1986_v42 = vrot.slane %v6177_v22, 5 }
 0x108   : > { %5601 = vmatmul.mubr.msk.bf16.gmra.mrb[16].mxu1 %vm484_vm4, %v6162_v41  ;;  %v3760_v41 = vsel %vm6606_vm6, %v5118_v57, %v3759_v0  ;;  %v3770_v63 = vsel %vm6606_vm6, %v3768_v12, %v3769_v31  ;;  %v3780_v0 = vrot.slane %v7169_v16, 6  ;;  %v3787_v16 = vrot.slane %v7172_v24, 6  ;;  %v5102_v31 = vld [vmem:[%s6398_s11 + $0xb4] sm:$0xc] }
 0x109   : > { %5604 = vmatprep.mubr.msk.bf16.mxu1 %vm484_vm4, %v6163_v33  ;;  %v5096_v33 = vld [vmem:[%s6398_s11 + $0x90] sm:$0xc]  ;;  %v5134_v27 = vcombine.low %v3760_v41, %v3763_v39  ;;  %v5135_v3 = vcombine.low %v3767_v53, %v3770_v63  ;;  %v6178_v39 = vld [vmem:[%s6398_s11 + $0xac] sm:$0xf]  ;;  %v1988_v25 = vrot.slane %v1986_v42, 4  ;;  %v1989_v12 = vrot.slane %v4777_v15, 5 }
 0x10a   : > { %v3782_v2 = vrot.slane %v3780_v0, 4  ;;  %v3789_v41 = vrot.slane %v3787_v16, 4  ;;  %v1993_v14 = vrot.slane %v6178_v39, 5  ;;  %v5123_v44 = vrot.slane %v5102_v31, 10 }
 0x10b   : > { %5755 = vmatmul.mubr.msk.bf16.vlgmr.msra.gmra.mrb[0].mxu0 %vm484_vm4, %v5129_v30  ;;  %v5120_v30 = vrot.slane %v5096_v33, 10  ;;  %v3781_v33 = vsel %vm6606_vm6, %v5121_v13, %v3780_v0  ;;  %v1990_v38 = vsel %vm6400_vm3, %v1988_v25, %v1989_v12  ;;  %v4781_v0 = vld [vmem:[%s6398_s11 + $0xb4] sm:$0xe]  ;;  %v4787_v25 = vld [vmem:[%s6398_s11 + $0xcc] sm:$0xe] }
 0x10c   : > { %5758 = vmatprep.mubr.msk.bf16.mxu0 %vm484_vm4, %v5130_v10  ;;  %v3775_v10 = vrot.slane %v3773_v11, 4  ;;  %v3791_v20 = vsel %vm6606_vm6, %v3789_v41, %v3790_v7  ;;  %v1995_v36 = vrot.slane %v1993_v14, 4  ;;  %v3795_v58 = vsel %vm6606_vm6, %v5123_v44, %v3794_v50 }
 0x10d   : > { %v3774_v19 = vsel %vm6606_vm6, %v5120_v30, %v3773_v11  ;;  %v3788_v30 = vsel %vm6606_vm6, %v5122_v5, %v3787_v16  ;;  %v4784_v16 = vld [vmem:[%s6398_s11 + $0xc0] sm:$0xe]  ;;  %v5107_v5 = vld [vmem:[%s6398_s11 + $0xd4] sm:$0x3]  ;;  %v3815_v41 = vrot.slane %v7224_v59, 6 }
 0x10e   : > { %v5138_v63 = vcombine.low %v3788_v30, %v3791_v20  ;;  %v4804_v7 = vrot.slane %v4784_v16, 9  ;;  %v6181_v59 = vld [vmem:[%s6398_s11 + $0xd0] sm:$0xf] }
 0x10f   : > { %v2014_v12 = vrot.slane %v6181_v59, 5 }
 0x110   : > { %5605 = vmatmul.mubr.msk.bf16.gmra.mrb[20].mxu1 %vm484_vm4, %v6164_v17  ;;  %v1974_v17 = vrot.slane %v1972_v18, 4  ;;  %v4780_v18 = vld [vmem:[%s6398_s11 + $0xb0] sm:$0x1] }
 0x111   : > { %5608 = vmatprep.mubr.msk.bf16.mxu1 %vm484_vm4, %v6165_v23  ;;  %v4774_v23 = vld [vmem:[%s6398_s11 + $0x98] sm:$0x1]  ;;  %v1996_v56 = vrot.slane %v4780_v18, 5 }
 0x112   : > { %v1982_v57 = vrot.slane %v4774_v23, 5  ;;  %v1976_v60 = vsel %vm6400_vm3, %v1974_v17, %v1975_v29  ;;  %v5105_v17 = vld [vmem:[%s6398_s11 + $0xc8] sm:$0x3]  ;;  %v3796_v23 = vrot.slane %v3794_v50, 4  ;;  %v3803_v29 = vrot.slane %v3801_v54, 4 }
 0x113   : > { %5759 = vmatmul.mubr.msk.bf16.gmra.mrb[4].mxu0 %vm484_vm4, %v5131_v43  ;;  %v3777_v43 = vsel %vm6606_vm6, %v3775_v10, %v3776_v34  ;;  %v4815_v32 = vcombine.low %v1973_v61, %v1976_v60  ;;  %v5103_v10 = vld [vmem:[%s6398_s11 + $0xbc] sm:$0x3]  ;;  %v5104_v34 = vld [vmem:[%s6398_s11 + $0xc0] sm:$0xc]  ;;  %v3804_v46 = vrot.slane %v5105_v17, 6  ;;  %v4803_v60 = vrot.slane %v4781_v0, 9 }
 0x114   : > { %5762 = vmatprep.mubr.msk.bf16.mxu0 %vm484_vm4, %v5132_v21  ;;  %v5099_v21 = vld [vmem:[%s6398_s11 + $0xa4] sm:$0x3]  ;;  %v5136_v24 = vcombine.low %v3774_v19, %v3777_v43  ;;  %v1983_v11 = vsel %vm6400_vm3, %v1981_v55, %v1982_v57  ;;  %v5124_v53 = vrot.slane %v5104_v34, 10  ;;  %v1994_v43 = vsel %vm6400_vm3, %v4802_v35, %v1993_v14 }
 0x115   : > { %v2007_v55 = vrot.slane %v6180_v51, 5  ;;  %v4805_v35 = vrot.slane %v4787_v25, 9 }
 0x116   : > { %v3802_v13 = vsel %vm6606_vm6, %v5124_v53, %v3801_v54 }
 0x117   : > { %v2009_v15 = vrot.slane %v2007_v55, 4  ;;  %v2008_v31 = vsel %vm6400_vm3, %v4804_v7, %v2007_v55  ;;  %v2015_v53 = vsel %vm6400_vm3, %v4805_v35, %v2014_v12 }
 0x118   : > { %5609 = vmatmul.mubr.msk.bf16.gmra.mrb[24].mxu1 %vm484_vm4, %v6166_v4  ;;  %v3783_v4 = vrot.slane %v5099_v21, 6  ;;  %v1997_v21 = vsel %vm6400_vm3, %v1995_v36, %v1996_v56  ;;  %v2016_v56 = vrot.slane %v2014_v12, 4 }
 0x119   : > { %5612 = vmatprep.mubr.msk.bf16.mxu1 %vm484_vm4, %v6167_v40  ;;  %v4775_v40 = vld [vmem:[%s6398_s11 + $0x9c] sm:$0xe] }
 0x11a   : > { %v4801_v48 = vrot.slane %v4775_v40, 9  ;;  %v3805_v40 = vsel %vm6606_vm6, %v3803_v29, %v3804_v46 }
 0x11b   : > { %5763 = vmatmul.mubr.msk.bf16.gmra.mrb[8].mxu0 %vm484_vm4, %v5133_v37  ;;  %v3784_v37 = vsel %vm6606_vm6, %v3782_v2, %v3783_v4  ;;  %v3808_v2 = vrot.slane %v7221_v6, 6  ;;  %v4818_v4 = vcombine.low %v1994_v43, %v1997_v21  ;;  %v5109_v6 = vld [vmem:[%s6398_s11 + $0xe0] sm:$0x3]  ;;  %v5140_v9 = vcombine.low %v3802_v13, %v3805_v40 }
 0x11c   : > { %5766 = vmatprep.mubr.msk.bf16.mxu0 %vm484_vm4, %v5134_v27  ;;  %v4816_v27 = vcombine.low %v1980_v52, %v1983_v11  ;;  %v5137_v45 = vcombine.low %v3781_v33, %v3784_v37  ;;  %v1987_v1 = vsel %vm6400_vm3, %v4801_v48, %v1986_v42  ;;  %v2003_v42 = vrot.slane %v4783_v49, 5  ;;  %v5108_v11 = vld [vmem:[%s6398_s11 + $0xd8] sm:$0xc] }
 0x11d   : > { %v4817_v57 = vcombine.low %v1987_v1, %v1990_v38  ;;  %v3810_v33 = vrot.slane %v3808_v2, 4  ;;  %v3811_v48 = vrot.slane %v5107_v5, 6  ;;  %v5126_v37 = vrot.slane %v5108_v11, 10 }
 0x11e   : > { %v3818_v30 = vrot.slane %v5109_v6, 6  ;;  %v3822_v1 = vrot.slane %v7247_v26, 6 }
 0x11f   : > { %v3812_v20 = vsel %vm6606_vm6, %v3810_v33, %v3811_v48  ;;  %v3816_v44 = vsel %vm6606_vm6, %v5126_v37, %v3815_v41 }
 0x120   : > { %5613 = vmatmul.mubr.msk.bf16.gmra.mrb[28].mxu1 %vm484_vm4, %v6168_v62  ;;  %v3797_v62 = vrot.slane %v5103_v10, 6  ;;  %v4789_v10 = vld [vmem:[%s6398_s11 + $0xd4] sm:$0x1]  ;;  %v3824_v46 = vrot.slane %v3822_v1, 4 }
 0x121   : > { %5634 = vmatprep.mubr.msk.bf16.mxu1 %vm484_vm4, %v4814_v47  ;;  %v6179_v47 = vld [vmem:[%s6398_s11 + $0xb8] sm:$0xf]  ;;  %v2017_v17 = vrot.slane %v4789_v10, 5 }
 0x122   : > { %v2000_v19 = vrot.slane %v6179_v47, 5  ;;  %v3798_v61 = vsel %vm6606_vm6, %v3796_v23, %v3797_v62  ;;  %v5111_v23 = vld [vmem:[%s6398_s11 + $0xec] sm:$0x3] }
 0x123   : > { %5767 = vmatmul.mubr.msk.bf16.gmra.mrb[12].mxu0 %vm484_vm4, %v5135_v3  ;;  %v4786_v3 = vld [vmem:[%s6398_s11 + $0xc8] sm:$0x1]  ;;  %v5139_v39 = vcombine.low %v3795_v58, %v3798_v61  ;;  %v2018_v26 = vsel %vm6400_vm3, %v2016_v56, %v2017_v17  ;;  %v3825_v0 = vrot.slane %v5111_v23, 6 }
 0x124   : > { %5770 = vmatprep.mubr.msk.bf16.mxu0 %vm484_vm4, %v5136_v24  ;;  %v2002_v22 = vrot.slane %v2000_v19, 4  ;;  %v5106_v24 = vld [vmem:[%s6398_s11 + $0xcc] sm:$0xc]  ;;  %v2010_v52 = vrot.slane %v4786_v3, 5  ;;  %v2001_v14 = vsel %vm6400_vm3, %v4803_v60, %v2000_v19  ;;  %v4821_v47 = vcombine.low %v2015_v53, %v2018_v26 }
 0x125   : > { %v3826_v43 = vsel %vm6606_vm6, %v3824_v46, %v3825_v0 }
 0x126   : > { %v2004_v18 = vsel %vm6400_vm3, %v2002_v22, %v2003_v42  ;;  %v2011_v50 = vsel %vm6400_vm3, %v2009_v15, %v2010_v52 }
 0x127   : > { %v4819_v34 = vcombine.low %v2001_v14, %v2004_v18  ;;  %v4820_v36 = vcombine.low %v2008_v31, %v2011_v50 }
 0x128   : > { %5635 = vmatmul.mubr.msk.bf16.vlgmr.msra.gmra.mrb[16].mxu1 %vm484_vm4, %v4815_v32  ;;  %v5125_v32 = vrot.slane %v5106_v24, 10 }
 0x129   : > { %5638 = vmatprep.mubr.msk.bf16.mxu1 %vm484_vm4, %v4816_v27  ;;  %v3817_v27 = vrot.slane %v3815_v41, 4 }
 0x12a   : > { %v3809_v54 = vsel %vm6606_vm6, %v5125_v32, %v3808_v2 }
 0x12b   : > { %5771 = vmatmul.mubr.msk.bf16.gmra.mrb[16].mxu0 %vm484_vm4, %v5137_v45  ;;  %v5110_v45 = vld [vmem:[%s6398_s11 + $0xe4] sm:$0xc]  ;;  %v3819_v38 = vsel %vm6606_vm6, %v3817_v27, %v3818_v30  ;;  %v5141_v62 = vcombine.low %v3809_v54, %v3812_v20  ;;  %s4410_s11 = sshll.u32 %s7497_s9, 4  ;;  %s7525_s11 = int_to_ptr.vmem [resolvable:$true] %s4410_s11 }
 0x12c   : > { %5774 = vmatprep.mubr.msk.bf16.mxu0 %vm484_vm4, %v5138_v63  ;;  %v5127_v63 = vrot.slane %v5110_v45, 10  ;;  %v5142_v29 = vcombine.low %v3816_v44, %v3819_v38  ;;  %s6182_s26 = scalar_lea.vmem %s7525_s11, 2048  ;;  %p6189_p1 = scmp.lt.s32.totalorder %s7525_s11, %s6187_s28 }
 0x12d   : > { %p6183_p12 = scmp.ne.s32.totalorder %s7525_s11, %s6182_s26  ;;  %p6190_p2 = scmp.lt.s32.totalorder %s6188_s29, %s6182_s26 }
 0x12e   : > { %v3823_v19 = vsel %vm6606_vm6, %v5127_v63, %v3822_v1 }
 0x12f   : > { %v5143_v21 = vcombine.low %v3823_v19, %v3826_v43  ;;  %p6184_p13 = pnand %p6183_p12, %p6358_p4  ;;  %p6191_p3 = por %p6190_p2, %p6189_p1 }
 0x130   : > { %5639 = vmatmul.mubr.msk.bf16.gmra.mrb[20].mxu1 %vm484_vm4, %v4817_v57 }
 0x131   : > { %5642 = vmatprep.mubr.msk.bf16.mxu1 %vm484_vm4, %v4818_v4  ;;  %p6185_p0 = pneg %p6184_p13 }
 0x133   : > { %5775 = vmatmul.mubr.msk.bf16.gmra.mrb[20].mxu0 %vm484_vm4, %v5139_v39  ;;  %p6192_p5 = pnand %p6191_p3, %p6185_p0 }
 0x134   : > { %5778 = vmatprep.mubr.msk.bf16.mxu0 %vm484_vm4, %v5140_v9 }
 0x138   : > { %5643 = vmatmul.mubr.msk.bf16.gmra.mrb[24].mxu1 %vm484_vm4, %v4819_v34 }
 0x139   : > { %5646 = vmatprep.mubr.msk.bf16.mxu1 %vm484_vm4, %v4820_v36 }
 0x13b   : > { %5779 = vmatmul.mubr.msk.bf16.gmra.mrb[24].mxu0 %vm484_vm4, %v5141_v62 }
 0x13c   : > { %5782 = vmatprep.mubr.msk.bf16.mxu0 %vm484_vm4, %v5142_v29 }
 0x140   : > { %5647 = vmatmul.mubr.msk.bf16.gmra.mrb[28].mxu1 %vm484_vm4, %v4821_v47 }
 0x143   : > { %5783 = vmatmul.mubr.msk.bf16.gmra.mrb[28].mxu0 %vm484_vm4, %v5143_v21 }
 0x1bb   : > { %v5586_v8 = vpop.f32.mrb[0].mxu1 }
 0x1bc   : > { %v1652_v49 = vpop.f32.mrb[1].mxu1 }
 0x1bd   : > { %v5587_v51 = vpop.f32.mrb[2].mxu1 }
 0x1be   : > { %v1655_v55 = vpop.f32.mrb[3].mxu1 }
 0x1c3   : > { %v5590_v57 = vpop.f32.mrb[4].mxu1 }
 0x1c4   : > { %v1668_v58 = vpop.f32.mrb[5].mxu1 }
 0x1c5   : > { %v5591_v16 = vpop.f32.mrb[6].mxu1 }
 0x1c6   : > { %v1671_v3 = vpop.f32.mrb[7].mxu1 }
 0x1cb   : > { %v5594_v61 = vpop.f32.mrb[8].mxu1 }
 0x1cc   : > { %v1684_v13 = vpop.f32.mrb[9].mxu1 }
 0x1cd   : > { %v5595_v60 = vpop.f32.mrb[10].mxu1 }
 0x1ce   : > { %v7483_v2 = vpop.f32.mrb[11].mxu1 }
 0x1d3   : > { %v7485_v28 = vpop.f32.mrb[12].mxu1 }
 0x1d4   : > { %v7487_v4 = vpop.f32.mrb[13].mxu1 }
 0x1d5   : > { %v7489_v40 = vpop.f32.mrb[14].mxu1 }
 0x1d6   : > { %v7491_v22 = vpop.f32.mrb[15].mxu1 }
 0x1de   : > { %v5756_v42 = vpop.f32.mrb[0].mxu0 }
 0x1df   : > { %v5788_v24 = vadd.f32 %v5756_v42, %v5586_v8  ;;  %v3961_v5 = vpop.f32.mrb[1].mxu0 }
 0x1e0   : > { %v5789_v7 = vadd.f32 %v3961_v5, %v1652_v49  ;;  %v5757_v15 = vpop.f32.mrb[2].mxu0 }
 0x1e1   : > { %v5790_v52 = vadd.f32 %v5757_v15, %v5587_v51  ;;  %v3964_v11 = vpop.f32.mrb[3].mxu0  ;;  %v4160_v48 = vmul.f32 %v5788_v24, %v5788_v24 }
 0x1e2   : > { %v5791_v41 = vadd.f32 %v3964_v11, %v1655_v55  ;;  %v4158_v6 = vmul.f32 %v5789_v7, %v5789_v7 }
 0x1e3   : > { %v5240_v39 = vpack.c.bf16 %v5790_v52, %v5788_v24  ;;  %v4161_v12 = vmul.f32 %v5790_v52, %v5790_v52 }
 0x1e4   : > { %v4120_v14 = vadd.f32 %v5791_v41, %v5789_v7  ;;  %v4159_v32 = vmul.f32 %v5791_v41, %v5791_v41  ;;  %v5235_v33 = vpack.c.bf16 %v5791_v41, %v5789_v7 }
 0x1e5   : > { %5312 = vst [vmem:[%s7497_s9 + $0x8] sm:$0xff] %v5240_v39  }
 0x1e6   : > { %v4121_v9 = vadd.f32 %v5788_v24, %v4120_v14  ;;  %v4190_v18 = vadd.f32 %v4159_v32, %v4158_v6  ;;  %5236 = vst [vmem:[%s7497_s9] sm:$0xff] %v5235_v33   ;;  %v5760_v37 = vpop.f32.mrb[4].mxu0 }
 0x1e7   : > { %v5792_v25 = vadd.f32 %v5760_v37, %v5590_v57  ;;  %v3977_v59 = vpop.f32.mrb[5].mxu0 }
 0x1e8   : > { %v4191_v31 = vadd.f32 %v4190_v18, %v4160_v48  ;;  %v5793_v50 = vadd.f32 %v3977_v59, %v1668_v58  ;;  %v4122_v27 = vadd.f32 %v5790_v52, %v4121_v9  ;;  %v5761_v30 = vpop.f32.mrb[6].mxu0 }
 0x1e9   : > { %v5794_v10 = vadd.f32 %v5761_v30, %v5591_v16  ;;  %v3980_v34 = vpop.f32.mrb[7].mxu0  ;;  %v4164_v38 = vmul.f32 %v5792_v25, %v5792_v25 }
 0x1ea   : > { %v4123_v54 = vadd.f32 %v5793_v50, %v4122_v27  ;;  %v4162_v20 = vmul.f32 %v5793_v50, %v5793_v50  ;;  %v4192_v35 = vadd.f32 %v4191_v31, %v4161_v12  ;;  %v5795_v36 = vadd.f32 %v3980_v34, %v1671_v3 }
 0x1eb   : > { %v5250_v56 = vpack.c.bf16 %v5794_v10, %v5792_v25  ;;  %v4165_v26 = vmul.f32 %v5794_v10, %v5794_v10 }
 0x1ec   : > { %v4193_v17 = vadd.f32 %v4192_v35, %v4162_v20  ;;  %v4124_v45 = vadd.f32 %v5795_v36, %v4123_v54  ;;  %v4163_v1 = vmul.f32 %v5795_v36, %v5795_v36  ;;  %v5245_v44 = vpack.c.bf16 %v5795_v36, %v5793_v50 }
 0x1ed   : > { %5314 = vst [vmem:[%s7497_s9 + $0x18] sm:$0xff] %v5250_v56  }
 0x1ee   : > { %v4125_v23 = vadd.f32 %v5792_v25, %v4124_v45  ;;  %v4194_v62 = vadd.f32 %v4193_v17, %v4163_v1  ;;  %5313 = vst [vmem:[%s7497_s9 + $0x10] sm:$0xff] %v5245_v44   ;;  %v5764_v53 = vpop.f32.mrb[8].mxu0 }
 0x1ef   : > { %v5796_v63 = vadd.f32 %v5764_v53, %v5594_v61  ;;  %v3993_v29 = vpop.f32.mrb[9].mxu0 }
 0x1f0   : > { %v4195_v46 = vadd.f32 %v4194_v62, %v4164_v38  ;;  %v5797_v0 = vadd.f32 %v3993_v29, %v1684_v13  ;;  %v4126_v47 = vadd.f32 %v5794_v10, %v4125_v23  ;;  %v5765_v19 = vpop.f32.mrb[10].mxu0 }
 0x1f1   : > { %v5798_v43 = vadd.f32 %v5765_v19, %v5595_v60  ;;  %v3996_v21 = vpop.f32.mrb[11].mxu0  ;;  %v4168_v42 = vmul.f32 %v5796_v63, %v5796_v63 }
 0x1f2   : > { %v4127_v8 = vadd.f32 %v5797_v0, %v4126_v47  ;;  %v4166_v49 = vmul.f32 %v5797_v0, %v5797_v0  ;;  %v4196_v51 = vadd.f32 %v4195_v46, %v4165_v26  ;;  %v5799_v55 = vadd.f32 %v3996_v21, %v7483_v2 }
 0x1f3   : > { %v5260_v57 = vpack.c.bf16 %v5798_v43, %v5796_v63  ;;  %v4169_v15 = vmul.f32 %v5798_v43, %v5798_v43 }
 0x1f4   : > { %v4197_v58 = vadd.f32 %v4196_v51, %v4166_v49  ;;  %v4128_v16 = vadd.f32 %v5799_v55, %v4127_v8  ;;  %v4167_v3 = vmul.f32 %v5799_v55, %v5799_v55  ;;  %v5255_v61 = vpack.c.bf16 %v5799_v55, %v5797_v0 }
 0x1f5   : > { %5316 = vst [vmem:[%s7497_s9 + $0x28] sm:$0xff] %v5260_v57  }
 0x1f6   : > { %v4129_v24 = vadd.f32 %v5796_v63, %v4128_v16  ;;  %v4198_v5 = vadd.f32 %v4197_v58, %v4167_v3  ;;  %5315 = vst [vmem:[%s7497_s9 + $0x20] sm:$0xff] %v5255_v61   ;;  %v5768_v13 = vpop.f32.mrb[12].mxu0 }
 0x1f7   : > { %v5800_v7 = vadd.f32 %v5768_v13, %v7485_v28  ;;  %v4009_v60 = vpop.f32.mrb[13].mxu0 }
 0x1f8   : > { %v4199_v52 = vadd.f32 %v4198_v5, %v4168_v42  ;;  %v5801_v11 = vadd.f32 %v4009_v60, %v7487_v4  ;;  %v4130_v41 = vadd.f32 %v5798_v43, %v4129_v24  ;;  %v5769_v2 = vpop.f32.mrb[14].mxu0 }
 0x1f9   : > { %v5802_v39 = vadd.f32 %v5769_v2, %v7489_v40  ;;  %v4012_v6 = vpop.f32.mrb[15].mxu0  ;;  %v4172_v50 = vmul.f32 %v5800_v7, %v5800_v7 }
 0x1fa   : > { %v4131_v14 = vadd.f32 %v5801_v11, %v4130_v41  ;;  %v4170_v32 = vmul.f32 %v5801_v11, %v5801_v11  ;;  %v4200_v33 = vadd.f32 %v4199_v52, %v4169_v15  ;;  %v5803_v48 = vadd.f32 %v4012_v6, %v7491_v22 }
 0x1fb   : > { %v5636_v9 = vpop.f32.mrb[16].mxu1  ;;  %v5270_v18 = vpack.c.bf16 %v5802_v39, %v5800_v7  ;;  %v4173_v54 = vmul.f32 %v5802_v39, %v5802_v39 }
 0x1fc   : > { %v2217_v28 = vpop.f32.mrb[17].mxu1  ;;  %v4201_v37 = vadd.f32 %v4200_v33, %v4170_v32  ;;  %v4132_v25 = vadd.f32 %v5803_v48, %v4131_v14  ;;  %v4171_v59 = vmul.f32 %v5803_v48, %v5803_v48  ;;  %v5265_v12 = vpack.c.bf16 %v5803_v48, %v5801_v11 }
 0x1fd   : > { %v5637_v4 = vpop.f32.mrb[18].mxu1  ;;  %5318 = vst [vmem:[%s7497_s9 + $0x38] sm:$0xff] %v5270_v18  }
 0x1fe   : > { %v2220_v31 = vpop.f32.mrb[19].mxu1  ;;  %v4133_v27 = vadd.f32 %v5800_v7, %v4132_v25  ;;  %v4202_v40 = vadd.f32 %v4201_v37, %v4171_v59  ;;  %5317 = vst [vmem:[%s7497_s9 + $0x30] sm:$0xff] %v5265_v12   ;;  %v5772_v30 = vpop.f32.mrb[16].mxu0 }
 0x1ff   : > { %v5804_v10 = vadd.f32 %v5772_v30, %v5636_v9  ;;  %v4025_v34 = vpop.f32.mrb[17].mxu0 }
 0x200   : > { %v4203_v20 = vadd.f32 %v4202_v40, %v4172_v50  ;;  %v5805_v22 = vadd.f32 %v4025_v34, %v2217_v28  ;;  %v4134_v35 = vadd.f32 %v5802_v39, %v4133_v27  ;;  %v5773_v36 = vpop.f32.mrb[18].mxu0 }
 0x201   : > { %v5806_v56 = vadd.f32 %v5773_v36, %v5637_v4  ;;  %v4028_v17 = vpop.f32.mrb[19].mxu0  ;;  %v4176_v19 = vmul.f32 %v5804_v10, %v5804_v10 }
 0x202   : > { %v4135_v45 = vadd.f32 %v5805_v22, %v4134_v35  ;;  %v4174_v1 = vmul.f32 %v5805_v22, %v5805_v22  ;;  %v4204_v44 = vadd.f32 %v4203_v20, %v4173_v54  ;;  %v5807_v38 = vadd.f32 %v4028_v17, %v2220_v31 }
 0x203   : > { %v5640_v23 = vpop.f32.mrb[20].mxu1  ;;  %v5280_v62 = vpack.c.bf16 %v5806_v56, %v5804_v10  ;;  %v4177_v55 = vmul.f32 %v5806_v56, %v5806_v56 }
 0x204   : > { %v2233_v53 = vpop.f32.mrb[21].mxu1  ;;  %v4205_v63 = vadd.f32 %v4204_v44, %v4174_v1  ;;  %v4136_v29 = vadd.f32 %v5807_v38, %v4135_v45  ;;  %v4175_v26 = vmul.f32 %v5807_v38, %v5807_v38  ;;  %v5275_v46 = vpack.c.bf16 %v5807_v38, %v5805_v22 }
 0x205   : > { %v5641_v0 = vpop.f32.mrb[22].mxu1  ;;  %5320 = vst [vmem:[%s7497_s9 + $0x48] sm:$0xff] %v5280_v62  }
 0x206   : > { %v2236_v47 = vpop.f32.mrb[23].mxu1  ;;  %v4137_v43 = vadd.f32 %v5804_v10, %v4136_v29  ;;  %v4206_v21 = vadd.f32 %v4205_v63, %v4175_v26  ;;  %5319 = vst [vmem:[%s7497_s9 + $0x40] sm:$0xff] %v5275_v46   ;;  %v5776_v8 = vpop.f32.mrb[20].mxu0 }
 0x207   : > { %v5808_v49 = vadd.f32 %v5776_v8, %v5640_v23  ;;  %v4041_v51 = vpop.f32.mrb[21].mxu0 }
 0x208   : > { %v4207_v57 = vadd.f32 %v4206_v21, %v4176_v19  ;;  %v5809_v58 = vadd.f32 %v4041_v51, %v2233_v53  ;;  %v4138_v16 = vadd.f32 %v5806_v56, %v4137_v43  ;;  %v5777_v3 = vpop.f32.mrb[22].mxu0 }
 0x209   : > { %v5810_v61 = vadd.f32 %v5777_v3, %v5641_v0  ;;  %v4044_v42 = vpop.f32.mrb[23].mxu0  ;;  %v4180_v32 = vmul.f32 %v5808_v49, %v5808_v49 }
 0x20a   : > { %v4139_v24 = vadd.f32 %v5809_v58, %v4138_v16  ;;  %v4178_v5 = vmul.f32 %v5809_v58, %v5809_v58  ;;  %v4208_v13 = vadd.f32 %v4207_v57, %v4177_v55  ;;  %v5811_v7 = vadd.f32 %v4044_v42, %v2236_v47 }
 0x20b   : > { %v5644_v60 = vpop.f32.mrb[24].mxu1  ;;  %v5290_v15 = vpack.c.bf16 %v5810_v61, %v5808_v49  ;;  %v4181_v37 = vmul.f32 %v5810_v61, %v5810_v61 }
 0x20c   : > { %v2249_v52 = vpop.f32.mrb[25].mxu1  ;;  %v4209_v11 = vadd.f32 %v4208_v13, %v4178_v5  ;;  %v4140_v41 = vadd.f32 %v5811_v7, %v4139_v24  ;;  %v4179_v2 = vmul.f32 %v5811_v7, %v5811_v7  ;;  %v5285_v39 = vpack.c.bf16 %v5811_v7, %v5809_v58 }
 0x20d   : > { %v5645_v6 = vpop.f32.mrb[26].mxu1  ;;  %5322 = vst [vmem:[%s7497_s9 + $0x58] sm:$0xff] %v5290_v15  }
 0x20e   : > { %v2252_v14 = vpop.f32.mrb[27].mxu1  ;;  %v4141_v33 = vadd.f32 %v5808_v49, %v4140_v41  ;;  %v4210_v48 = vadd.f32 %v4209_v11, %v4179_v2  ;;  %5321 = vst [vmem:[%s7497_s9 + $0x50] sm:$0xff] %v5285_v39   ;;  %v5780_v9 = vpop.f32.mrb[24].mxu0 }
 0x20f   : > { %v5812_v18 = vadd.f32 %v5780_v9, %v5644_v60  ;;  %v4057_v28 = vpop.f32.mrb[25].mxu0 }
 0x210   : > { %v4211_v25 = vadd.f32 %v4210_v48, %v4180_v32  ;;  %v5813_v59 = vadd.f32 %v4057_v28, %v2249_v52  ;;  %v4142_v12 = vadd.f32 %v5810_v61, %v4141_v33  ;;  %v5781_v4 = vpop.f32.mrb[26].mxu0 }
 0x211   : > { %v5814_v31 = vadd.f32 %v5781_v4, %v5645_v6  ;;  %v4060_v50 = vpop.f32.mrb[27].mxu0  ;;  %v4184_v1 = vmul.f32 %v5812_v18, %v5812_v18 }
 0x212   : > { %v4143_v27 = vadd.f32 %v5813_v59, %v4142_v12  ;;  %v4182_v40 = vmul.f32 %v5813_v59, %v5813_v59  ;;  %v4212_v30 = vadd.f32 %v4211_v25, %v4181_v37  ;;  %v5815_v10 = vadd.f32 %v4060_v50, %v2252_v14 }
 0x213   : > { %v5648_v34 = vpop.f32.mrb[28].mxu1  ;;  %v5300_v54 = vpack.c.bf16 %v5814_v31, %v5812_v18  ;;  %v4185_v63 = vmul.f32 %v5814_v31, %v5814_v31 }
 0x214   : > { %v2265_v20 = vpop.f32.mrb[29].mxu1  ;;  %v4213_v22 = vadd.f32 %v4212_v30, %v4182_v40  ;;  %v4144_v35 = vadd.f32 %v5815_v10, %v4143_v27  ;;  %v4183_v36 = vmul.f32 %v5815_v10, %v5815_v10  ;;  %v5295_v56 = vpack.c.bf16 %v5815_v10, %v5813_v59 }
 0x215   : > { %v5649_v17 = vpop.f32.mrb[30].mxu1  ;;  %5324 = vst [vmem:[%s7497_s9 + $0x68] sm:$0xff] %v5300_v54  }
 0x216   : > { %v2268_v45 = vpop.f32.mrb[31].mxu1  ;;  %v4145_v44 = vadd.f32 %v5812_v18, %v4144_v35  ;;  %v4214_v38 = vadd.f32 %v4213_v22, %v4183_v36  ;;  %5323 = vst [vmem:[%s7497_s9 + $0x60] sm:$0xff] %v5295_v56   ;;  %v5784_v23 = vpop.f32.mrb[28].mxu0 }
 0x217   : > { %v5816_v62 = vadd.f32 %v5784_v23, %v5648_v34  ;;  %v4073_v53 = vpop.f32.mrb[29].mxu0 }
 0x218   : > { %v4215_v29 = vadd.f32 %v4214_v38, %v4184_v1  ;;  %v5817_v26 = vadd.f32 %v4073_v53, %v2265_v20  ;;  %v4146_v46 = vadd.f32 %v5814_v31, %v4145_v44  ;;  %v5785_v0 = vpop.f32.mrb[30].mxu0 }
 0x219   : > { %v5818_v47 = vadd.f32 %v5785_v0, %v5649_v17  ;;  %v4076_v19 = vpop.f32.mrb[31].mxu0  ;;  %v4188_v3 = vmul.f32 %v5816_v62, %v5816_v62 }
 0x21a   : > { %v4147_v43 = vadd.f32 %v5817_v26, %v4146_v46  ;;  %v4186_v21 = vmul.f32 %v5817_v26, %v5817_v26  ;;  %v4216_v8 = vadd.f32 %v4215_v29, %v4185_v63  ;;  %v5819_v49 = vadd.f32 %v4076_v19, %v2268_v45 }
 0x21b   : > { %v5310_v51 = vpack.c.bf16 %v5818_v47, %v5816_v62 }
 0x21c   : > { %v4217_v55 = vadd.f32 %v4216_v8, %v4186_v21  ;;  %v4148_v57 = vadd.f32 %v5819_v49, %v4147_v43  ;;  %v4187_v58 = vmul.f32 %v5819_v49, %v5819_v49  ;;  %v5305_v16 = vpack.c.bf16 %v5819_v49, %v5817_v26 }
 0x21d   : > { %5326 = vst [vmem:[%s7497_s9 + $0x78] sm:$0xff] %v5310_v51  }
 0x21e   : > { %v4149_v61 = vadd.f32 %v5816_v62, %v4148_v57  ;;  %v4218_v42 = vadd.f32 %v4217_v55, %v4187_v58  ;;  %5325 = vst [vmem:[%s7497_s9 + $0x70] sm:$0xff] %v5305_v16  }
 0x21f   : > { %6195 = shalt.err (!%p6192_p5)
}
 0x220   : > { %s6196_s30 = scalar_lea.hbm %s7523_s21, 2048  ;;  %s6200_s6 = scalar_lea.hbm %s7608_s2, 4096 }
 0x221   : > { %p6197_p6 = scmp.ne.s32.totalorder %s7523_s21, %s6196_s30  ;;  %p6201_p10 = scmp.lt.u32.totalorder %s7523_s21, %s7608_s2 }
 0x222   : > { %p6202_p11 = scmp.lt.u32.totalorder %s6200_s6, %s6196_s30  ;;  %p6204_p13 = scmp.lt.u32.totalorder %s6196_s30, %s7523_s21 }
 0x223   : > { %p6198_p7 = pnand %p6197_p6, %p6358_p4 }
 0x224   : > { %p6203_p12 = por %p6202_p11, %p6201_p10 }
 0x225   : > { %p6199_p9 = pneg %p6198_p7 }
 0x226   : > { %p6205_p0 = por %p6204_p13, %p6203_p12 }
 0x228   : > { %p6206_p1 = pnand %p6205_p0, %p6199_p9 }
 0x22a   : > { %6209 = shalt.err (!%p6206_p1)
}
 0x22b   : > { %s6295_s10 = smov 64   ;;  %s6296_s18 = smov 4   ;;  %v4189_v24 = vmul.f32 %v5818_v47, %v5818_v47  ;;  %v4150_v5 = vadd.f32 %v5818_v47, %v4149_v61  ;;  %v4219_v13 = vadd.f32 %v4218_v42, %v4188_v3 }
 0x22c   : > { %6055 = dma.vmem_to_hbm [thread:$0]  (%p6358_p4), %s7525_s11, 2048, %s7523_s21, %s4389_s23, %s6295_s10, %s6295_s10, %s6296_s18  }
 0x22d   : > { %v4151_v7 = vrot.slane %v4150_v5, 4  ;;  %v4220_v60 = vadd.f32 %v4219_v13, %v4189_v24  ;;  %s4546_s19 = sshll.u32 %s7494_s7, 1  ;;  %s5196_s26 = sshll.u32 %s6284_s15, 5 }
 0x22e   : > { %s190_s27 = scalar_lea.vmem [#allocation4], %s4546_s19  ;;  %s7558_s23 = scalar_lea.hbm %s7609_s3, %s5196_s26 }
 0x22f   : > { %v4152_v15 = vadd.f32 %v4151_v7, %v4150_v5  ;;  %v4221_v52 = vrot.slane %v4220_v60, 4  ;;  %s4427_s28 = sshll.u32 %s190_s27, 4  ;;  %s4394_s29 = scalar_lea.sflag [#allocation5], %s7494_s7  ;;  %s7560_s28 = int_to_ptr.vmem [resolvable:$true] %s4427_s28 }
 0x230   : > { %s6210_s30 = scalar_lea.vmem %s7560_s28, 32  ;;  %s6297_s15 = smov [#allocation4]  }
 0x231   : > { %v4153_v11 = vrot.slane %v4152_v15, 2  ;;  %v4222_v41 = vadd.f32 %v4221_v52, %v4220_v60  ;;  %p6211_p2 = scmp.ne.s32.totalorder %s7560_s28, %s6210_s30  ;;  %s6214_s4 = sshll.u32 %s6297_s15, 4  ;;  %s6215_s4 = int_to_ptr.vmem [resolvable:$false] %s6214_s4 }
 0x232   : > { %s6216_s5 = scalar_lea.vmem %s6215_s4, 64  ;;  %p6217_p6 = scmp.lt.s32.totalorder %s7560_s28, %s6215_s4 }
 0x233   : > { %v4154_v2 = vadd.f32 %v4153_v11, %v4152_v15  ;;  %v4223_v39 = vrot.slane %v4222_v41, 2  ;;  %p6212_p3 = pnand %p6211_p2, %p6358_p4  ;;  %p6218_p7 = scmp.lt.s32.totalorder %s6216_s5, %s6210_s30 }
 0x235   : > { %v4155_v6 = vrot.slane %v4154_v2, 1  ;;  %v4224_v14 = vadd.f32 %v4223_v39, %v4222_v41  ;;  %p6213_p5 = pneg %p6212_p3  ;;  %p6219_p9 = por %p6218_p7, %p6217_p6 }
 0x237   : > { %v4156_v32 = vadd.f32 %v4155_v6, %v4154_v2  ;;  %v4225_v33 = vrot.slane %v4224_v14, 1  ;;  %p6220_p10 = pnand %p6219_p9, %p6213_p5 }
 0x239   : > { %4157 = vst [vmem:[%s190_s27] sm:$0x1] %v4156_v32  ;;  %v4226_v48 = vadd.f32 %v4225_v33, %v4224_v14 }
 0x23b   : > { %4227 = vst [vmem:[%s190_s27 + $0x1] sm:$0x1] %v4226_v48 }
 0x23c   : > { %6223 = shalt.err (!%p6220_p10)
}
 0x23d   : > { %s6224_s7 = scalar_lea.hbm %s7558_s23, 32  ;;  %s6228_s9 = scalar_lea.hbm %s7609_s3, 64 }
 0x23e   : > { %p6225_p11 = scmp.ne.s32.totalorder %s7558_s23, %s6224_s7  ;;  %p6229_p0 = scmp.lt.u32.totalorder %s7558_s23, %s7609_s3 }
 0x23f   : > { %p6230_p1 = scmp.lt.u32.totalorder %s6228_s9, %s6224_s7  ;;  %p6232_p3 = scmp.lt.u32.totalorder %s6224_s7, %s7558_s23 }
 0x240   : > { %p6226_p12 = pnand %p6225_p11, %p6358_p4 }
 0x241   : > { %p6231_p2 = por %p6230_p1, %p6229_p0 }
 0x242   : > { %p6227_p13 = pneg %p6226_p12 }
 0x243   : > { %p6233_p5 = por %p6232_p3, %p6231_p2 }
 0x245   : > { %p6234_p6 = pnand %p6233_p5, %p6227_p13 }
 0x247   : > { %6237 = shalt.err (!%p6234_p6)
}
 0x248   : > { %6056 = dma.vmem_to_hbm [thread:$0]  (%p6358_p4), %s7560_s28, 32, %s7558_s23, %s4394_s29  }
 0x249 PF: > { %p6066_p7 = scmp.ge.s32.totalorder %s6292_s17, 2  ;;  %s4439_s19 = sand.u32 1, %s6272_s12  }
 0x24a   : > { %s4440_s26 = scalar_lea.sflag [#allocation3], %s4439_s19 }
 0x24b   : > { %p6060_p9 = pnand %p6066_p7, %p6365_p8 }
 0x24d   : > { %6263 = dma.done.wait (!%p6060_p9), %s4440_s26, 2048  }
 0x24e   : > { %6265 = vsyncadd (!%p6060_p9), %s4440_s26, 4294965248  ;;  %s4449_s27 = scalar_lea.sflag [#allocation5], %s4439_s19 }
 0x24f   : > { %6267 = dma.done.wait (!%p6060_p9), %s4449_s27, 32  }
 0x250   : > { %6269 = vsyncadd (!%p6060_p9), %s4449_s27, 4294967264  ;;  %s20_s17 = sadd.s32 1, %s6292_s17   ;;  %s7616_s12 = smov %s6276_s13 }
 0x251   : > { %p17_p10 = scmp.ge.s32.totalorder %s20_s17, 4   ;;  %s7617_s13 = smov %s6280_s14 }
 0x252   : > { %s7618_s14 = smov %s6371_s25  ;;  %s7619_s15 = smov %s6288_s16 }
 0x253   : > { %s7620_s16 = smov %s7622_s20  ;;  %19 = sbr.rel (!%p17_p10) target bundleno = 6 (0x6), region = 83 }
 0x25a   :  { %4454 = vsyncpa [#allocation3], 1 }
 0x25b   :  { %4456 = vsyncpa [#allocation3 + $0x1], 1 }
 0x25c   :  { %4457 = vsyncpa [#allocation5], 1 }
 0x25d   :  { %4459 = vsyncpa [#allocation5 + $0x1], 1 }

</bundles_post_ra>
